<compile_context>
chip_gen: v6e
topology: v6e:2x2x1
jax: 0.10.0
libtpu: 0.0.40
codegen_flags: <defaults>
</compile_context>

<pallas_src>
import jax
import jax.numpy as jnp
from jax.experimental import pallas as pl

NUM_CLASSES = 2
OVERLAP_THRESH = 0.35
NEG_POS_RATIO = 7
VARIANCE = (0.1, 0.2)


# --------------------------- Pallas kernels ---------------------------------
def _match_encode_loss_kernel(truths_ref, tgt_t_ref, priors_t_ref,
                              locp_ref, landmp_ref, conf_ref,
                              loss_l_ref, loss_landm_ref, cost_ref,
                              pos_ref, npos1_ref):
    # truths_ref  : [B, NT, 4]   GT boxes (xyxy), NT on sublanes
    # tgt_t_ref   : [B, 16, NT]  GT features transposed (rows 0-3 box,
    #                            4-13 landmarks, 14 label, 15 zero pad)
    # priors_t_ref: [4, P]       priors (cx, cy, w, h) as rows (lane-dense)
    # locp_ref    : [B, 4, P]    loc predictions
    # landmp_ref  : [B, 10, P]   landmark predictions
    # conf_ref    : [B, C, P]    class logits
    # outputs: loss_l [1,1], loss_landm [1,1], cost [B,P], pos [B,P], npos1 [1,1]
    B, NT, _ = truths_ref.shape
    P = priors_t_ref.shape[1]
    v0, v1 = VARIANCE

    pr = priors_t_ref[...]
    cx, cy, w, h = pr[0:1, :], pr[1:2, :], pr[2:3, :], pr[3:4, :]   # [1, P]
    # point_form(priors)
    bx1 = cx - 0.5 * w
    by1 = cy - 0.5 * h
    bx2 = cx + 0.5 * w
    by2 = cy + 0.5 * h
    area_b = (bx2 - bx1) * (by2 - by1)                              # [1, P]
    inv_w = pl.reciprocal(w, approx=True)
    inv_h = pl.reciprocal(h, approx=True)
    inv_v0w = inv_w * (1.0 / v0)
    inv_v0h = inv_h * (1.0 / v0)

    # landmark rows: even rows are x-coords, odd rows are y-coords
    lrow = jax.lax.broadcasted_iota(jnp.int32, (10, 1), 0)
    is_x = (lrow % 2) == 0
    lm_center = jnp.where(is_x, cx, cy)                             # [10, P]
    lm_invscale = jnp.where(is_x, inv_v0w, inv_v0h)                 # [10, P]

    # global max over all class logits (torch log_sum_exp uses x.data.max())
    confs = [conf_ref[b] for b in range(B)]
    gmax = None
    for c in confs:
        m = jnp.max(jnp.max(c, axis=1, keepdims=True), axis=0, keepdims=True)
        gmax = m if gmax is None else jnp.maximum(gmax, m)

    row_nt = jax.lax.broadcasted_iota(jnp.int32, (NT, P), 0)
    col_nt = jax.lax.broadcasted_iota(jnp.int32, (NT, P), 1)

    loss_l = jnp.zeros((1, 1), jnp.float32)
    loss_landm = jnp.zeros((1, 1), jnp.float32)
    npos1 = jnp.zeros((1, 1), jnp.float32)
    for b in range(B):
        # ---------------- jaccard(truths, point_form(priors)) ----------------
        t = truths_ref[b]                                           # [NT, 4]
        ax1, ay1, ax2, ay2 = t[:, 0:1], t[:, 1:2], t[:, 2:3], t[:, 3:4]
        iw = jnp.maximum(jnp.minimum(ax2, bx2) - jnp.maximum(ax1, bx1), 0.0)
        ih = jnp.maximum(jnp.minimum(ay2, by2) - jnp.maximum(ay1, by1), 0.0)
        inter = iw * ih                                             # [NT, P]
        area_a = (ax2 - ax1) * (ay2 - ay1)                          # [NT, 1]
        union = area_a + area_b - inter
        ov = inter * pl.reciprocal(union, approx=True)              # [NT, P]

        # best truth per prior (over NT, sublanes) / best prior per truth (lanes)
        bt_ov = jnp.max(ov, axis=0, keepdims=True)                  # [1, P]
        bt_idx = jnp.min(jnp.where(ov == bt_ov, row_nt, NT),
                         axis=0, keepdims=True)                     # [1, P]
        bp_ov = jnp.max(ov, axis=1, keepdims=True)                  # [NT, 1]
        bp_idx = jnp.min(jnp.where(ov == bp_ov, col_nt, P),
                         axis=1, keepdims=True)                     # [NT, 1]

        # torch: best_truth_overlap.index_fill_(best_prior_idx, 2) followed by
        # sequential best_truth_idx[best_prior_idx[j]] = j  (last write wins)
        hit = col_nt == bp_idx                                      # [NT, P]
        last_j = jnp.max(jnp.where(hit, row_nt, -1), axis=0, keepdims=True)
        forced = last_j >= 0
        bt_ov = jnp.where(forced, 2.0, bt_ov)
        bt_idx = jnp.where(forced, last_j, bt_idx)

        # -------- gather matched GT features via one-hot matmul (MXU) --------
        onehot = (bt_idx == row_nt).astype(jnp.float32)             # [NT, P]
        gt_feat = jnp.dot(tgt_t_ref[b], onehot,
                          preferred_element_type=jnp.float32)       # [16, P]
        m = gt_feat[0:4, :]                                         # matched boxes
        lm = gt_feat[4:14, :]                                       # matched landmarks
        conf_lbl = gt_feat[14:15, :]                                # matched labels
        conf_lbl = jnp.where(bt_ov < OVERLAP_THRESH, 0.0, conf_lbl)

        pos = conf_lbl != 0.0                                       # [1, P]
        pos1 = conf_lbl > 0.0
        npos1 = npos1 + jnp.sum(pos1.astype(jnp.float32), axis=1, keepdims=True)

        # -------- encode(matched, priors) fused with masked smooth-L1 --------
        g_cx = ((m[0:1] + m[2:3]) * 0.5 - cx) * inv_v0w
        g_cy = ((m[1:2] + m[3:4]) * 0.5 - cy) * inv_v0h
        # TODO(synk): degenerate (zero-width) matched boxes give log(0) here,
        # exactly as in the torch reference; the value is masked to 0 below.
        g_w = jnp.log((m[2:3] - m[0:1]) * inv_w) * (1.0 / v1)
        g_h = jnp.log((m[3:4] - m[1:2]) * inv_h) * (1.0 / v1)
        loc_t = jnp.concatenate([g_cx, g_cy, g_w, g_h], axis=0)     # [4, P]
        d = locp_ref[b] - loc_t
        ad = jnp.abs(d)
        sl1 = jnp.where(ad < 1.0, 0.5 * d * d, ad - 0.5)
        sl1 = jnp.where(pos, sl1, 0.0)
        loss_l = loss_l + jnp.sum(jnp.sum(sl1, axis=1, keepdims=True),
                                  axis=0, keepdims=True)

        # -------- encode_landm fused with masked smooth-L1 --------------------
        landm_t = (lm - lm_center) * lm_invscale
        dl = landmp_ref[b] - landm_t
        adl = jnp.abs(dl)
        sll = jnp.where(adl < 1.0, 0.5 * dl * dl, adl - 0.5)
        sll = jnp.where(pos1, sll, 0.0)
        loss_landm = loss_landm + jnp.sum(jnp.sum(sll, axis=1, keepdims=True),
                                          axis=0, keepdims=True)

        # -------- hard-negative-mining cost: log_sum_exp(conf) - conf[gt] -----
        c = confs[b]                                                # [C, P]
        lse = jnp.log(jnp.sum(jnp.exp(c - gmax), axis=0, keepdims=True)) + gmax
        gt = pos.astype(jnp.int32)                                  # conf_t[pos] = 1
        crow = jax.lax.broadcasted_iota(jnp.int32, c.shape, 0)
        gathered = jnp.sum(jnp.where(crow == gt, c, 0.0), axis=0, keepdims=True)
        cost = jnp.where(pos, 0.0, lse - gathered)                  # [1, P]

        cost_ref[pl.ds(b, 1), :] = cost
        pos_ref[pl.ds(b, 1), :] = pos.astype(jnp.float32)

    loss_l_ref[...] = loss_l
    loss_landm_ref[...] = loss_landm
    npos1_ref[...] = npos1


def _ce_masked_sum_kernel(conf_ref, pos_ref, sel_ref, out_ref):
    # per-prior softmax cross-entropy, summed over selected (pos | hard-neg) priors
    B = conf_ref.shape[0]
    acc = jnp.zeros((1, 1), jnp.float32)
    for b in range(B):
        c = conf_ref[b]                                             # [C, P]
        xm = jnp.max(c, axis=0, keepdims=True)                      # [1, P]
        lse = jnp.log(jnp.sum(jnp.exp(c - xm), axis=0, keepdims=True)) + xm
        pos = pos_ref[pl.ds(b, 1), :]                               # [1, P]
        gt = (pos > 0.0).astype(jnp.int32)                          # conf_t[pos] = 1
        crow = jax.lax.broadcasted_iota(jnp.int32, c.shape, 0)
        gathered = jnp.sum(jnp.where(crow == gt, c, 0.0), axis=0, keepdims=True)
        per = jnp.where(sel_ref[pl.ds(b, 1), :] > 0.0, lse - gathered, 0.0)
        acc = acc + jnp.sum(per, axis=1, keepdims=True)
    out_ref[...] = acc


# --------------------------- wrappers ----------------------------------------
def fused_match_losses_pallas(truths, targets_t, priors_t, locp_t, landmp_t, confp_t):
    B, NT, _ = truths.shape
    P = priors_t.shape[1]
    return pl.pallas_call(
        _match_encode_loss_kernel,
        out_shape=(jax.ShapeDtypeStruct((1, 1), jnp.float32),
                   jax.ShapeDtypeStruct((1, 1), jnp.float32),
                   jax.ShapeDtypeStruct((B, P), jnp.float32),
                   jax.ShapeDtypeStruct((B, P), jnp.float32),
                   jax.ShapeDtypeStruct((1, 1), jnp.float32)),
    )(truths, targets_t, priors_t, locp_t, landmp_t, confp_t)


def ce_masked_sum_pallas(confp_t, pos_f, sel_f):
    return pl.pallas_call(
        _ce_masked_sum_kernel,
        out_shape=jax.ShapeDtypeStruct((1, 1), jnp.float32),
    )(confp_t, pos_f, sel_f)[0, 0]


# --------------------------- MultiBoxLoss forward -----------------------------
@jax.jit
def multibox_loss(loc_data, conf_data, landm_data, priors, targets):
    B, P, _ = loc_data.shape
    truths = targets[:, :, :4]                                      # [B, NT, 4]

    # lane-dense layouts: P (and NT) on the 128-lane axis, features on sublanes
    targets_t = jnp.pad(jnp.transpose(targets, (0, 2, 1)),
                        ((0, 0), (0, 1), (0, 0)))                   # [B, 16, NT]
    locp_t = jnp.transpose(loc_data, (0, 2, 1))                     # [B, 4, P]
    landmp_t = jnp.transpose(landm_data, (0, 2, 1))                 # [B, 10, P]
    confp_t = jnp.transpose(conf_data, (0, 2, 1))                   # [B, C, P]
    priors_t = priors.T                                             # [4, P]

    loss_l_sum, loss_landm_sum, cost, pos_f, npos1 = fused_match_losses_pallas(
        truths, targets_t, priors_t, locp_t, landmp_t, confp_t)

    # hard negative mining: single argsort + scatter-rank (== argsort(argsort))
    num_pos = jnp.sum(pos_f, axis=1, keepdims=True)                 # [B, 1]
    num_neg = jnp.minimum(NEG_POS_RATIO * num_pos, float(P - 1))
    loss_idx = jnp.argsort(-cost, axis=1)
    batch_ix = jnp.arange(B)[:, None]
    ranks = jnp.zeros((B, P), jnp.int32).at[batch_ix, loss_idx].set(
        jnp.broadcast_to(jnp.arange(P, dtype=jnp.int32)[None, :], (B, P)))
    neg = ranks.astype(jnp.float32) < num_neg
    sel_f = jnp.logical_or(pos_f > 0.0, neg).astype(jnp.float32)

    loss_c_sum = ce_masked_sum_pallas(confp_t, pos_f, sel_f)

    n = jnp.maximum(jnp.sum(num_pos), 1.0)
    n1 = jnp.maximum(npos1[0, 0], 1.0)
    loss_l = loss_l_sum[0, 0] / n
    loss_c = loss_c_sum / n
    loss_landm = loss_landm_sum[0, 0] / n1
    return loss_l, loss_c, loss_landm


if __name__ == "__main__":
    key = jax.random.PRNGKey(0)
    B, P, NT, C = 2, 256, 8, NUM_CLASSES
    k1, k2, k3, k4, k5, k6 = jax.random.split(key, 6)

    # network predictions (deterministic synthetic values)
    loc_data = jax.random.normal(k1, (B, P, 4), jnp.float32)
    conf_data = jax.random.normal(k2, (B, P, C), jnp.float32)
    landm_data = jax.random.normal(k3, (B, P, 10), jnp.float32)

    # priors: (cx, cy, w, h), normalized
    cxy = jax.random.uniform(k4, (P, 2), jnp.float32, 0.1, 0.9)
    wh = jax.random.uniform(k5, (P, 2), jnp.float32, 0.05, 0.3)
    priors = jnp.concatenate([cxy, wh], axis=1)

    # targets: [B, NT, 15] = xyxy boxes + 10 landmark coords + label (1 or -1)
    tk1, tk2, tk3 = jax.random.split(k6, 3)
    xy1 = jax.random.uniform(tk1, (B, NT, 2), jnp.float32, 0.05, 0.5)
    dwh = jax.random.uniform(tk2, (B, NT, 2), jnp.float32, 0.1, 0.4)
    boxes = jnp.concatenate([xy1, xy1 + dwh], axis=-1)
    lms = jax.random.uniform(tk3, (B, NT, 10), jnp.float32, 0.0, 1.0)
    labels = jnp.tile(jnp.array([1., 1., -1., 1., 1., -1., 1., 1.],
                                jnp.float32), (B, 1))[..., None]
    targets = jnp.concatenate([boxes, lms, labels], axis=-1)

    out = multibox_loss(loc_data, conf_data, landm_data, priors, targets)
    jax.block_until_ready(out)
    print("KERNEL_OK")
</pallas_src>

<mosaic_0001>
module attributes {stable_mosaic.version = 11 : i64} {
  func.func @_match_encode_loss_kernel(%arg0: memref<2x8x4xf32, #tpu.memory_space<vmem>>, %arg1: memref<2x16x8xf32, #tpu.memory_space<vmem>>, %arg2: memref<4x256xf32, #tpu.memory_space<vmem>>, %arg3: memref<2x4x256xf32, #tpu.memory_space<vmem>>, %arg4: memref<2x10x256xf32, #tpu.memory_space<vmem>>, %arg5: memref<2x2x256xf32, #tpu.memory_space<vmem>>, %arg6: memref<1x1xf32, #tpu.memory_space<vmem>>, %arg7: memref<1x1xf32, #tpu.memory_space<vmem>>, %arg8: memref<2x256xf32, #tpu.memory_space<vmem>>, %arg9: memref<2x256xf32, #tpu.memory_space<vmem>>, %arg10: memref<1x1xf32, #tpu.memory_space<vmem>>) attributes {dimension_semantics = [], scalar_prefetch = 0 : i64, scratch_operands = 0 : i64, tpu.core_type = #tpu.core_type<tc>} {
    %c0 = arith.constant 0 : index
    %c0_0 = arith.constant 0 : index
    %0 = vector.load %arg2[%c0, %c0_0] : memref<4x256xf32, #tpu.memory_space<vmem>>, vector<4x256xf32>
    %1 = vector.extract_strided_slice %0 {offsets = [0, 0], sizes = [1, 256], strides = [1, 1]} : vector<4x256xf32> to vector<1x256xf32>
    %2 = vector.extract_strided_slice %0 {offsets = [1, 0], sizes = [1, 256], strides = [1, 1]} : vector<4x256xf32> to vector<1x256xf32>
    %3 = vector.extract_strided_slice %0 {offsets = [2, 0], sizes = [1, 256], strides = [1, 1]} : vector<4x256xf32> to vector<1x256xf32>
    %4 = vector.extract_strided_slice %0 {offsets = [3, 0], sizes = [1, 256], strides = [1, 1]} : vector<4x256xf32> to vector<1x256xf32>
    %cst = arith.constant 5.000000e-01 : f32
    %5 = vector.broadcast %cst : f32 to vector<1x256xf32>
    %6 = arith.mulf %5, %3 : vector<1x256xf32>
    %7 = arith.subf %1, %6 : vector<1x256xf32>
    %cst_1 = arith.constant 5.000000e-01 : f32
    %8 = vector.broadcast %cst_1 : f32 to vector<1x256xf32>
    %9 = arith.mulf %8, %4 : vector<1x256xf32>
    %10 = arith.subf %2, %9 : vector<1x256xf32>
    %cst_2 = arith.constant 5.000000e-01 : f32
    %11 = vector.broadcast %cst_2 : f32 to vector<1x256xf32>
    %12 = arith.mulf %11, %3 : vector<1x256xf32>
    %13 = arith.addf %1, %12 : vector<1x256xf32>
    %cst_3 = arith.constant 5.000000e-01 : f32
    %14 = vector.broadcast %cst_3 : f32 to vector<1x256xf32>
    %15 = arith.mulf %14, %4 : vector<1x256xf32>
    %16 = arith.addf %2, %15 : vector<1x256xf32>
    %17 = arith.subf %13, %7 : vector<1x256xf32>
    %18 = arith.subf %16, %10 : vector<1x256xf32>
    %19 = arith.mulf %17, %18 : vector<1x256xf32>
    %20 = tpu.reciprocal %3 {approx = true} : vector<1x256xf32> -> vector<1x256xf32>
    %21 = tpu.reciprocal %4 {approx = true} : vector<1x256xf32> -> vector<1x256xf32>
    %cst_4 = arith.constant 1.000000e+01 : f32
    %22 = vector.broadcast %cst_4 : f32 to vector<1x256xf32>
    %23 = arith.mulf %20, %22 : vector<1x256xf32>
    %cst_5 = arith.constant 1.000000e+01 : f32
    %24 = vector.broadcast %cst_5 : f32 to vector<1x256xf32>
    %25 = arith.mulf %21, %24 : vector<1x256xf32>
    %26 = tpu.iota {dimensions = array<i32: 0>} : vector<10x1xi32>
    %c2_i32 = arith.constant 2 : i32
    %c0_i32 = arith.constant 0 : i32
    %27 = arith.cmpi eq, %c2_i32, %c0_i32 : i32
    %c1_i32 = arith.constant 1 : i32
    %28 = arith.select %27, %c1_i32, %c2_i32 : i32
    %29 = vector.broadcast %28 : i32 to vector<10x1xi32>
    %30 = arith.remsi %26, %29 : vector<10x1xi32>
    %c0_i32_6 = arith.constant 0 : i32
    %31 = vector.broadcast %c0_i32_6 : i32 to vector<10x1xi32>
    %32 = arith.cmpi ne, %30, %31 : vector<10x1xi32>
    %c0_i32_7 = arith.constant 0 : i32
    %33 = vector.broadcast %c0_i32_7 : i32 to vector<10x1xi32>
    %34 = arith.cmpi slt, %30, %33 : vector<10x1xi32>
    %c0_i32_8 = arith.constant 0 : i32
    %35 = arith.cmpi slt, %28, %c0_i32_8 : i32
    %36 = vector.broadcast %35 : i1 to vector<10x1xi1>
    %37 = vector.broadcast %36 : vector<10x1xi1> to vector<10x1xi1>
    %38 = arith.xori %34, %37 : vector<10x1xi1>
    %39 = arith.andi %38, %32 : vector<10x1xi1>
    %40 = vector.broadcast %28 : i32 to vector<10x1xi32>
    %41 = arith.addi %30, %40 : vector<10x1xi32>
    %42 = arith.select %39, %41, %30 : vector<10x1xi1>, vector<10x1xi32>
    %c0_i32_9 = arith.constant 0 : i32
    %43 = vector.broadcast %c0_i32_9 : i32 to vector<10x1xi32>
    %44 = arith.cmpi eq, %42, %43 : vector<10x1xi32>
    %45 = vector.shape_cast %44 : vector<10x1xi1> to vector<10x1xi1>
    %46 = vector.broadcast %45 : vector<10x1xi1> to vector<10x256xi1>
    %47 = vector.shape_cast %1 : vector<1x256xf32> to vector<1x256xf32>
    %48 = vector.broadcast %47 : vector<1x256xf32> to vector<10x256xf32>
    %49 = vector.shape_cast %2 : vector<1x256xf32> to vector<1x256xf32>
    %50 = vector.broadcast %49 : vector<1x256xf32> to vector<10x256xf32>
    %51 = arith.select %46, %48, %50 : vector<10x256xi1>, vector<10x256xf32>
    %52 = vector.shape_cast %44 : vector<10x1xi1> to vector<10x1xi1>
    %53 = vector.broadcast %52 : vector<10x1xi1> to vector<10x256xi1>
    %54 = vector.shape_cast %23 : vector<1x256xf32> to vector<1x256xf32>
    %55 = vector.broadcast %54 : vector<1x256xf32> to vector<10x256xf32>
    %56 = vector.shape_cast %25 : vector<1x256xf32> to vector<1x256xf32>
    %57 = vector.broadcast %56 : vector<1x256xf32> to vector<10x256xf32>
    %58 = arith.select %53, %55, %57 : vector<10x256xi1>, vector<10x256xf32>
    %c0_10 = arith.constant 0 : index
    %c0_11 = arith.constant 0 : index
    %c0_12 = arith.constant 0 : index
    %59 = vector.load %arg5[%c0_10, %c0_11, %c0_12] : memref<2x2x256xf32, #tpu.memory_space<vmem>>, vector<1x2x256xf32>
    %60 = vector.shape_cast %59 : vector<1x2x256xf32> to vector<2x256xf32>
    %c1 = arith.constant 1 : index
    %c0_13 = arith.constant 0 : index
    %c0_14 = arith.constant 0 : index
    %61 = vector.load %arg5[%c1, %c0_13, %c0_14] : memref<2x2x256xf32, #tpu.memory_space<vmem>>, vector<1x2x256xf32>
    %62 = vector.shape_cast %61 : vector<1x2x256xf32> to vector<2x256xf32>
    %cst_15 = arith.constant dense<0xFF800000> : vector<2xf32>
    %63 = vector.multi_reduction <maximumf>, %60, %cst_15 [1] : vector<2x256xf32> to vector<2xf32>
    %64 = vector.shape_cast %63 : vector<2xf32> to vector<2x1xf32>
    %cst_16 = arith.constant dense<0xFF800000> : vector<1xf32>
    %65 = vector.multi_reduction <maximumf>, %64, %cst_16 [0] : vector<2x1xf32> to vector<1xf32>
    %66 = vector.shape_cast %65 : vector<1xf32> to vector<1x1xf32>
    %cst_17 = arith.constant dense<0xFF800000> : vector<2xf32>
    %67 = vector.multi_reduction <maximumf>, %62, %cst_17 [1] : vector<2x256xf32> to vector<2xf32>
    %68 = vector.shape_cast %67 : vector<2xf32> to vector<2x1xf32>
    %cst_18 = arith.constant dense<0xFF800000> : vector<1xf32>
    %69 = vector.multi_reduction <maximumf>, %68, %cst_18 [0] : vector<2x1xf32> to vector<1xf32>
    %70 = vector.shape_cast %69 : vector<1xf32> to vector<1x1xf32>
    %71 = arith.maximumf %66, %70 : vector<1x1xf32>
    %72 = tpu.iota {dimensions = array<i32: 0>} : vector<8x256xi32>
    %73 = tpu.iota {dimensions = array<i32: 1>} : vector<8x256xi32>
    %cst_19 = arith.constant 0.000000e+00 : f32
    %74 = vector.broadcast %cst_19 : f32 to vector<1x1xf32>
    %cst_20 = arith.constant 0.000000e+00 : f32
    %75 = vector.broadcast %cst_20 : f32 to vector<1x1xf32>
    %cst_21 = arith.constant 0.000000e+00 : f32
    %76 = vector.broadcast %cst_21 : f32 to vector<1x1xf32>
    %c0_22 = arith.constant 0 : index
    %c0_23 = arith.constant 0 : index
    %c0_24 = arith.constant 0 : index
    %77 = vector.load %arg0[%c0_22, %c0_23, %c0_24] : memref<2x8x4xf32, #tpu.memory_space<vmem>>, vector<1x8x4xf32>
    %78 = vector.shape_cast %77 : vector<1x8x4xf32> to vector<8x4xf32>
    %79 = vector.extract_strided_slice %78 {offsets = [0, 0], sizes = [8, 1], strides = [1, 1]} : vector<8x4xf32> to vector<8x1xf32>
    %80 = vector.extract_strided_slice %78 {offsets = [0, 1], sizes = [8, 1], strides = [1, 1]} : vector<8x4xf32> to vector<8x1xf32>
    %81 = vector.extract_strided_slice %78 {offsets = [0, 2], sizes = [8, 1], strides = [1, 1]} : vector<8x4xf32> to vector<8x1xf32>
    %82 = vector.extract_strided_slice %78 {offsets = [0, 3], sizes = [8, 1], strides = [1, 1]} : vector<8x4xf32> to vector<8x1xf32>
    %83 = vector.broadcast %81 : vector<8x1xf32> to vector<8x256xf32>
    %84 = vector.broadcast %13 : vector<1x256xf32> to vector<8x256xf32>
    %85 = arith.minimumf %83, %84 : vector<8x256xf32>
    %86 = vector.broadcast %79 : vector<8x1xf32> to vector<8x256xf32>
    %87 = vector.broadcast %7 : vector<1x256xf32> to vector<8x256xf32>
    %88 = arith.maximumf %86, %87 : vector<8x256xf32>
    %89 = arith.subf %85, %88 : vector<8x256xf32>
    %cst_25 = arith.constant 0.000000e+00 : f32
    %90 = vector.broadcast %cst_25 : f32 to vector<8x256xf32>
    %91 = arith.maximumf %89, %90 : vector<8x256xf32>
    %92 = vector.broadcast %82 : vector<8x1xf32> to vector<8x256xf32>
    %93 = vector.broadcast %16 : vector<1x256xf32> to vector<8x256xf32>
    %94 = arith.minimumf %92, %93 : vector<8x256xf32>
    %95 = vector.broadcast %80 : vector<8x1xf32> to vector<8x256xf32>
    %96 = vector.broadcast %10 : vector<1x256xf32> to vector<8x256xf32>
    %97 = arith.maximumf %95, %96 : vector<8x256xf32>
    %98 = arith.subf %94, %97 : vector<8x256xf32>
    %cst_26 = arith.constant 0.000000e+00 : f32
    %99 = vector.broadcast %cst_26 : f32 to vector<8x256xf32>
    %100 = arith.maximumf %98, %99 : vector<8x256xf32>
    %101 = arith.mulf %91, %100 : vector<8x256xf32>
    %102 = arith.subf %81, %79 : vector<8x1xf32>
    %103 = arith.subf %82, %80 : vector<8x1xf32>
    %104 = arith.mulf %102, %103 : vector<8x1xf32>
    %105 = vector.broadcast %104 : vector<8x1xf32> to vector<8x256xf32>
    %106 = vector.broadcast %19 : vector<1x256xf32> to vector<8x256xf32>
    %107 = arith.addf %105, %106 : vector<8x256xf32>
    %108 = arith.subf %107, %101 : vector<8x256xf32>
    %109 = tpu.reciprocal %108 {approx = true} : vector<8x256xf32> -> vector<8x256xf32>
    %110 = arith.mulf %101, %109 : vector<8x256xf32>
    %cst_27 = arith.constant dense<0xFF800000> : vector<256xf32>
    %111 = vector.multi_reduction <maximumf>, %110, %cst_27 [0] : vector<8x256xf32> to vector<256xf32>
    %112 = vector.shape_cast %111 : vector<256xf32> to vector<1x256xf32>
    %113 = vector.broadcast %112 : vector<1x256xf32> to vector<8x256xf32>
    %114 = arith.cmpf oeq, %110, %113 : vector<8x256xf32>
    %c8_i32 = arith.constant 8 : i32
    %115 = vector.broadcast %c8_i32 : i32 to vector<8x256xi32>
    %116 = arith.select %114, %72, %115 : vector<8x256xi1>, vector<8x256xi32>
    %cst_28 = arith.constant dense<2147483647> : vector<256xi32>
    %117 = vector.multi_reduction <minsi>, %116, %cst_28 [0] : vector<8x256xi32> to vector<256xi32>
    %118 = vector.shape_cast %117 : vector<256xi32> to vector<1x256xi32>
    %cst_29 = arith.constant dense<0xFF800000> : vector<8xf32>
    %119 = vector.multi_reduction <maximumf>, %110, %cst_29 [1] : vector<8x256xf32> to vector<8xf32>
    %120 = vector.shape_cast %119 : vector<8xf32> to vector<8x1xf32>
    %121 = vector.broadcast %120 : vector<8x1xf32> to vector<8x256xf32>
    %122 = arith.cmpf oeq, %110, %121 : vector<8x256xf32>
    %c256_i32 = arith.constant 256 : i32
    %123 = vector.broadcast %c256_i32 : i32 to vector<8x256xi32>
    %124 = arith.select %122, %73, %123 : vector<8x256xi1>, vector<8x256xi32>
    %cst_30 = arith.constant dense<2147483647> : vector<8xi32>
    %125 = vector.multi_reduction <minsi>, %124, %cst_30 [1] : vector<8x256xi32> to vector<8xi32>
    %126 = vector.shape_cast %125 : vector<8xi32> to vector<8x1xi32>
    %127 = vector.broadcast %126 : vector<8x1xi32> to vector<8x256xi32>
    %128 = arith.cmpi eq, %73, %127 : vector<8x256xi32>
    %c-1_i32 = arith.constant -1 : i32
    %129 = vector.broadcast %c-1_i32 : i32 to vector<8x256xi32>
    %130 = arith.select %128, %72, %129 : vector<8x256xi1>, vector<8x256xi32>
    %cst_31 = arith.constant dense<-2147483648> : vector<256xi32>
    %131 = vector.multi_reduction <maxsi>, %130, %cst_31 [0] : vector<8x256xi32> to vector<256xi32>
    %132 = vector.shape_cast %131 : vector<256xi32> to vector<1x256xi32>
    %c0_i32_32 = arith.constant 0 : i32
    %133 = vector.broadcast %c0_i32_32 : i32 to vector<1x256xi32>
    %134 = arith.cmpi sge, %132, %133 : vector<1x256xi32>
    %cst_33 = arith.constant 2.000000e+00 : f32
    %135 = vector.broadcast %cst_33 : f32 to vector<1x256xf32>
    %136 = arith.select %134, %135, %112 : vector<1x256xi1>, vector<1x256xf32>
    %137 = arith.select %134, %132, %118 : vector<1x256xi1>, vector<1x256xi32>
    %138 = vector.broadcast %137 : vector<1x256xi32> to vector<8x256xi32>
    %139 = arith.cmpi eq, %138, %72 : vector<8x256xi32>
    %140 = arith.extui %139 : vector<8x256xi1> to vector<8x256xi32>
    %141 = arith.sitofp %140 : vector<8x256xi32> to vector<8x256xf32>
    %c0_34 = arith.constant 0 : index
    %c0_35 = arith.constant 0 : index
    %c0_36 = arith.constant 0 : index
    %142 = vector.load %arg1[%c0_34, %c0_35, %c0_36] : memref<2x16x8xf32, #tpu.memory_space<vmem>>, vector<1x16x8xf32>
    %143 = vector.shape_cast %142 : vector<1x16x8xf32> to vector<16x8xf32>
    %cst_37 = arith.constant dense<0.000000e+00> : vector<16x256xf32>
    %144 = tpu.matmul %143, %141, %cst_37 {dimension_numbers = #tpu.dot_dimension_numbers<[1], [0], [0], [1], [0, 0, 1, 1], [], []>} : vector<16x8xf32>, vector<8x256xf32>, vector<16x256xf32> -> vector<16x256xf32>
    %145 = vector.extract_strided_slice %144 {offsets = [0, 0], sizes = [4, 256], strides = [1, 1]} : vector<16x256xf32> to vector<4x256xf32>
    %146 = vector.extract_strided_slice %144 {offsets = [4, 0], sizes = [10, 256], strides = [1, 1]} : vector<16x256xf32> to vector<10x256xf32>
    %147 = vector.extract_strided_slice %144 {offsets = [14, 0], sizes = [1, 256], strides = [1, 1]} : vector<16x256xf32> to vector<1x256xf32>
    %cst_38 = arith.constant 3.500000e-01 : f32
    %148 = vector.broadcast %cst_38 : f32 to vector<1x256xf32>
    %149 = arith.cmpf olt, %136, %148 : vector<1x256xf32>
    %cst_39 = arith.constant 0.000000e+00 : f32
    %150 = vector.broadcast %cst_39 : f32 to vector<1x256xf32>
    %151 = arith.select %149, %150, %147 : vector<1x256xi1>, vector<1x256xf32>
    %cst_40 = arith.constant 0.000000e+00 : f32
    %152 = vector.broadcast %cst_40 : f32 to vector<1x256xf32>
    %153 = arith.cmpf one, %151, %152 : vector<1x256xf32>
    %cst_41 = arith.constant 0.000000e+00 : f32
    %154 = vector.broadcast %cst_41 : f32 to vector<1x256xf32>
    %155 = arith.cmpf ogt, %151, %154 : vector<1x256xf32>
    %156 = arith.extui %155 : vector<1x256xi1> to vector<1x256xi32>
    %157 = arith.sitofp %156 : vector<1x256xi32> to vector<1x256xf32>
    %cst_42 = arith.constant dense<0.000000e+00> : vector<1xf32>
    %158 = vector.multi_reduction <add>, %157, %cst_42 [1] : vector<1x256xf32> to vector<1xf32>
    %159 = vector.shape_cast %158 : vector<1xf32> to vector<1x1xf32>
    %160 = arith.addf %76, %159 : vector<1x1xf32>
    %161 = vector.extract_strided_slice %145 {offsets = [0, 0], sizes = [1, 256], strides = [1, 1]} : vector<4x256xf32> to vector<1x256xf32>
    %162 = vector.extract_strided_slice %145 {offsets = [2, 0], sizes = [1, 256], strides = [1, 1]} : vector<4x256xf32> to vector<1x256xf32>
    %163 = arith.addf %161, %162 : vector<1x256xf32>
    %cst_43 = arith.constant 5.000000e-01 : f32
    %164 = vector.broadcast %cst_43 : f32 to vector<1x256xf32>
    %165 = arith.mulf %163, %164 : vector<1x256xf32>
    %166 = arith.subf %165, %1 : vector<1x256xf32>
    %167 = arith.mulf %166, %23 : vector<1x256xf32>
    %168 = vector.extract_strided_slice %145 {offsets = [1, 0], sizes = [1, 256], strides = [1, 1]} : vector<4x256xf32> to vector<1x256xf32>
    %169 = vector.extract_strided_slice %145 {offsets = [3, 0], sizes = [1, 256], strides = [1, 1]} : vector<4x256xf32> to vector<1x256xf32>
    %170 = arith.addf %168, %169 : vector<1x256xf32>
    %cst_44 = arith.constant 5.000000e-01 : f32
    %171 = vector.broadcast %cst_44 : f32 to vector<1x256xf32>
    %172 = arith.mulf %170, %171 : vector<1x256xf32>
    %173 = arith.subf %172, %2 : vector<1x256xf32>
    %174 = arith.mulf %173, %25 : vector<1x256xf32>
    %175 = vector.extract_strided_slice %145 {offsets = [2, 0], sizes = [1, 256], strides = [1, 1]} : vector<4x256xf32> to vector<1x256xf32>
    %176 = vector.extract_strided_slice %145 {offsets = [0, 0], sizes = [1, 256], strides = [1, 1]} : vector<4x256xf32> to vector<1x256xf32>
    %177 = arith.subf %175, %176 : vector<1x256xf32>
    %178 = arith.mulf %177, %20 : vector<1x256xf32>
    %179 = math.log %178 : vector<1x256xf32>
    %cst_45 = arith.constant 5.000000e+00 : f32
    %180 = vector.broadcast %cst_45 : f32 to vector<1x256xf32>
    %181 = arith.mulf %179, %180 : vector<1x256xf32>
    %182 = vector.extract_strided_slice %145 {offsets = [3, 0], sizes = [1, 256], strides = [1, 1]} : vector<4x256xf32> to vector<1x256xf32>
    %183 = vector.extract_strided_slice %145 {offsets = [1, 0], sizes = [1, 256], strides = [1, 1]} : vector<4x256xf32> to vector<1x256xf32>
    %184 = arith.subf %182, %183 : vector<1x256xf32>
    %185 = arith.mulf %184, %21 : vector<1x256xf32>
    %186 = math.log %185 : vector<1x256xf32>
    %cst_46 = arith.constant 5.000000e+00 : f32
    %187 = vector.broadcast %cst_46 : f32 to vector<1x256xf32>
    %188 = arith.mulf %186, %187 : vector<1x256xf32>
    %189 = tpu.concatenate %167, %174, %181, %188 in 0 : vector<1x256xf32>, vector<1x256xf32>, vector<1x256xf32>, vector<1x256xf32> -> vector<4x256xf32>
    %c0_47 = arith.constant 0 : index
    %c0_48 = arith.constant 0 : index
    %c0_49 = arith.constant 0 : index
    %190 = vector.load %arg3[%c0_47, %c0_48, %c0_49] : memref<2x4x256xf32, #tpu.memory_space<vmem>>, vector<1x4x256xf32>
    %191 = vector.shape_cast %190 : vector<1x4x256xf32> to vector<4x256xf32>
    %192 = arith.subf %191, %189 : vector<4x256xf32>
    %193 = math.absf %192 : vector<4x256xf32>
    %cst_50 = arith.constant 1.000000e+00 : f32
    %194 = vector.broadcast %cst_50 : f32 to vector<4x256xf32>
    %195 = arith.cmpf olt, %193, %194 : vector<4x256xf32>
    %cst_51 = arith.constant 5.000000e-01 : f32
    %196 = vector.broadcast %cst_51 : f32 to vector<4x256xf32>
    %197 = arith.mulf %196, %192 : vector<4x256xf32>
    %198 = arith.mulf %197, %192 : vector<4x256xf32>
    %cst_52 = arith.constant 5.000000e-01 : f32
    %199 = vector.broadcast %cst_52 : f32 to vector<4x256xf32>
    %200 = arith.subf %193, %199 : vector<4x256xf32>
    %201 = arith.select %195, %198, %200 : vector<4x256xi1>, vector<4x256xf32>
    %cst_53 = arith.constant 0.000000e+00 : f32
    %202 = vector.shape_cast %153 : vector<1x256xi1> to vector<1x256xi1>
    %203 = vector.broadcast %202 : vector<1x256xi1> to vector<4x256xi1>
    %204 = vector.broadcast %cst_53 : f32 to vector<4x256xf32>
    %205 = arith.select %203, %201, %204 : vector<4x256xi1>, vector<4x256xf32>
    %cst_54 = arith.constant dense<0.000000e+00> : vector<4xf32>
    %206 = vector.multi_reduction <add>, %205, %cst_54 [1] : vector<4x256xf32> to vector<4xf32>
    %207 = vector.shape_cast %206 : vector<4xf32> to vector<4x1xf32>
    %cst_55 = arith.constant dense<0.000000e+00> : vector<1xf32>
    %208 = vector.multi_reduction <add>, %207, %cst_55 [0] : vector<4x1xf32> to vector<1xf32>
    %209 = vector.shape_cast %208 : vector<1xf32> to vector<1x1xf32>
    %210 = arith.addf %74, %209 : vector<1x1xf32>
    %211 = arith.subf %146, %51 : vector<10x256xf32>
    %212 = arith.mulf %211, %58 : vector<10x256xf32>
    %c0_56 = arith.constant 0 : index
    %c0_57 = arith.constant 0 : index
    %c0_58 = arith.constant 0 : index
    %213 = vector.load %arg4[%c0_56, %c0_57, %c0_58] : memref<2x10x256xf32, #tpu.memory_space<vmem>>, vector<1x10x256xf32>
    %214 = vector.shape_cast %213 : vector<1x10x256xf32> to vector<10x256xf32>
    %215 = arith.subf %214, %212 : vector<10x256xf32>
    %216 = math.absf %215 : vector<10x256xf32>
    %cst_59 = arith.constant 1.000000e+00 : f32
    %217 = vector.broadcast %cst_59 : f32 to vector<10x256xf32>
    %218 = arith.cmpf olt, %216, %217 : vector<10x256xf32>
    %cst_60 = arith.constant 5.000000e-01 : f32
    %219 = vector.broadcast %cst_60 : f32 to vector<10x256xf32>
    %220 = arith.mulf %219, %215 : vector<10x256xf32>
    %221 = arith.mulf %220, %215 : vector<10x256xf32>
    %cst_61 = arith.constant 5.000000e-01 : f32
    %222 = vector.broadcast %cst_61 : f32 to vector<10x256xf32>
    %223 = arith.subf %216, %222 : vector<10x256xf32>
    %224 = arith.select %218, %221, %223 : vector<10x256xi1>, vector<10x256xf32>
    %cst_62 = arith.constant 0.000000e+00 : f32
    %225 = vector.shape_cast %155 : vector<1x256xi1> to vector<1x256xi1>
    %226 = vector.broadcast %225 : vector<1x256xi1> to vector<10x256xi1>
    %227 = vector.broadcast %cst_62 : f32 to vector<10x256xf32>
    %228 = arith.select %226, %224, %227 : vector<10x256xi1>, vector<10x256xf32>
    %cst_63 = arith.constant dense<0.000000e+00> : vector<10xf32>
    %229 = vector.multi_reduction <add>, %228, %cst_63 [1] : vector<10x256xf32> to vector<10xf32>
    %230 = vector.shape_cast %229 : vector<10xf32> to vector<10x1xf32>
    %cst_64 = arith.constant dense<0.000000e+00> : vector<1xf32>
    %231 = vector.multi_reduction <add>, %230, %cst_64 [0] : vector<10x1xf32> to vector<1xf32>
    %232 = vector.shape_cast %231 : vector<1xf32> to vector<1x1xf32>
    %233 = arith.addf %75, %232 : vector<1x1xf32>
    %234 = vector.broadcast %71 : vector<1x1xf32> to vector<2x256xf32>
    %235 = arith.subf %60, %234 : vector<2x256xf32>
    %236 = math.exp %235 : vector<2x256xf32>
    %cst_65 = arith.constant dense<0.000000e+00> : vector<256xf32>
    %237 = vector.multi_reduction <add>, %236, %cst_65 [0] : vector<2x256xf32> to vector<256xf32>
    %238 = vector.shape_cast %237 : vector<256xf32> to vector<1x256xf32>
    %239 = math.log %238 : vector<1x256xf32>
    %240 = vector.broadcast %71 : vector<1x1xf32> to vector<1x256xf32>
    %241 = arith.addf %239, %240 : vector<1x256xf32>
    %242 = arith.extui %153 : vector<1x256xi1> to vector<1x256xi32>
    %243 = tpu.iota {dimensions = array<i32: 0>} : vector<2x256xi32>
    %244 = vector.broadcast %242 : vector<1x256xi32> to vector<2x256xi32>
    %245 = arith.cmpi eq, %243, %244 : vector<2x256xi32>
    %cst_66 = arith.constant 0.000000e+00 : f32
    %246 = vector.broadcast %cst_66 : f32 to vector<2x256xf32>
    %247 = arith.select %245, %60, %246 : vector<2x256xi1>, vector<2x256xf32>
    %cst_67 = arith.constant dense<0.000000e+00> : vector<256xf32>
    %248 = vector.multi_reduction <add>, %247, %cst_67 [0] : vector<2x256xf32> to vector<256xf32>
    %249 = vector.shape_cast %248 : vector<256xf32> to vector<1x256xf32>
    %250 = arith.subf %241, %249 : vector<1x256xf32>
    %cst_68 = arith.constant 0.000000e+00 : f32
    %251 = vector.broadcast %cst_68 : f32 to vector<1x256xf32>
    %252 = arith.select %153, %251, %250 : vector<1x256xi1>, vector<1x256xf32>
    %c0_69 = arith.constant 0 : index
    %c0_70 = arith.constant 0 : index
    %253 = vector.load %arg8[%c0_69, %c0_70] : memref<2x256xf32, #tpu.memory_space<vmem>>, vector<1x256xf32>
    tpu.vector_store %arg8[%c0_69, %c0_70], %252 {strides = array<i32>} : memref<2x256xf32, #tpu.memory_space<vmem>>, vector<1x256xf32>,
    %254 = arith.extui %153 : vector<1x256xi1> to vector<1x256xi32>
    %255 = arith.sitofp %254 : vector<1x256xi32> to vector<1x256xf32>
    %c0_71 = arith.constant 0 : index
    %c0_72 = arith.constant 0 : index
    %256 = vector.load %arg9[%c0_71, %c0_72] : memref<2x256xf32, #tpu.memory_space<vmem>>, vector<1x256xf32>
    tpu.vector_store %arg9[%c0_71, %c0_72], %255 {strides = array<i32>} : memref<2x256xf32, #tpu.memory_space<vmem>>, vector<1x256xf32>,
    %c1_73 = arith.constant 1 : index
    %c0_74 = arith.constant 0 : index
    %c0_75 = arith.constant 0 : index
    %257 = vector.load %arg0[%c1_73, %c0_74, %c0_75] : memref<2x8x4xf32, #tpu.memory_space<vmem>>, vector<1x8x4xf32>
    %258 = vector.shape_cast %257 : vector<1x8x4xf32> to vector<8x4xf32>
    %259 = vector.extract_strided_slice %258 {offsets = [0, 0], sizes = [8, 1], strides = [1, 1]} : vector<8x4xf32> to vector<8x1xf32>
    %260 = vector.extract_strided_slice %258 {offsets = [0, 1], sizes = [8, 1], strides = [1, 1]} : vector<8x4xf32> to vector<8x1xf32>
    %261 = vector.extract_strided_slice %258 {offsets = [0, 2], sizes = [8, 1], strides = [1, 1]} : vector<8x4xf32> to vector<8x1xf32>
    %262 = vector.extract_strided_slice %258 {offsets = [0, 3], sizes = [8, 1], strides = [1, 1]} : vector<8x4xf32> to vector<8x1xf32>
    %263 = vector.broadcast %261 : vector<8x1xf32> to vector<8x256xf32>
    %264 = vector.broadcast %13 : vector<1x256xf32> to vector<8x256xf32>
    %265 = arith.minimumf %263, %264 : vector<8x256xf32>
    %266 = vector.broadcast %259 : vector<8x1xf32> to vector<8x256xf32>
    %267 = vector.broadcast %7 : vector<1x256xf32> to vector<8x256xf32>
    %268 = arith.maximumf %266, %267 : vector<8x256xf32>
    %269 = arith.subf %265, %268 : vector<8x256xf32>
    %cst_76 = arith.constant 0.000000e+00 : f32
    %270 = vector.broadcast %cst_76 : f32 to vector<8x256xf32>
    %271 = arith.maximumf %269, %270 : vector<8x256xf32>
    %272 = vector.broadcast %262 : vector<8x1xf32> to vector<8x256xf32>
    %273 = vector.broadcast %16 : vector<1x256xf32> to vector<8x256xf32>
    %274 = arith.minimumf %272, %273 : vector<8x256xf32>
    %275 = vector.broadcast %260 : vector<8x1xf32> to vector<8x256xf32>
    %276 = vector.broadcast %10 : vector<1x256xf32> to vector<8x256xf32>
    %277 = arith.maximumf %275, %276 : vector<8x256xf32>
    %278 = arith.subf %274, %277 : vector<8x256xf32>
    %cst_77 = arith.constant 0.000000e+00 : f32
    %279 = vector.broadcast %cst_77 : f32 to vector<8x256xf32>
    %280 = arith.maximumf %278, %279 : vector<8x256xf32>
    %281 = arith.mulf %271, %280 : vector<8x256xf32>
    %282 = arith.subf %261, %259 : vector<8x1xf32>
    %283 = arith.subf %262, %260 : vector<8x1xf32>
    %284 = arith.mulf %282, %283 : vector<8x1xf32>
    %285 = vector.broadcast %284 : vector<8x1xf32> to vector<8x256xf32>
    %286 = vector.broadcast %19 : vector<1x256xf32> to vector<8x256xf32>
    %287 = arith.addf %285, %286 : vector<8x256xf32>
    %288 = arith.subf %287, %281 : vector<8x256xf32>
    %289 = tpu.reciprocal %288 {approx = true} : vector<8x256xf32> -> vector<8x256xf32>
    %290 = arith.mulf %281, %289 : vector<8x256xf32>
    %cst_78 = arith.constant dense<0xFF800000> : vector<256xf32>
    %291 = vector.multi_reduction <maximumf>, %290, %cst_78 [0] : vector<8x256xf32> to vector<256xf32>
    %292 = vector.shape_cast %291 : vector<256xf32> to vector<1x256xf32>
    %293 = vector.broadcast %292 : vector<1x256xf32> to vector<8x256xf32>
    %294 = arith.cmpf oeq, %290, %293 : vector<8x256xf32>
    %c8_i32_79 = arith.constant 8 : i32
    %295 = vector.broadcast %c8_i32_79 : i32 to vector<8x256xi32>
    %296 = arith.select %294, %72, %295 : vector<8x256xi1>, vector<8x256xi32>
    %cst_80 = arith.constant dense<2147483647> : vector<256xi32>
    %297 = vector.multi_reduction <minsi>, %296, %cst_80 [0] : vector<8x256xi32> to vector<256xi32>
    %298 = vector.shape_cast %297 : vector<256xi32> to vector<1x256xi32>
    %cst_81 = arith.constant dense<0xFF800000> : vector<8xf32>
    %299 = vector.multi_reduction <maximumf>, %290, %cst_81 [1] : vector<8x256xf32> to vector<8xf32>
    %300 = vector.shape_cast %299 : vector<8xf32> to vector<8x1xf32>
    %301 = vector.broadcast %300 : vector<8x1xf32> to vector<8x256xf32>
    %302 = arith.cmpf oeq, %290, %301 : vector<8x256xf32>
    %c256_i32_82 = arith.constant 256 : i32
    %303 = vector.broadcast %c256_i32_82 : i32 to vector<8x256xi32>
    %304 = arith.select %302, %73, %303 : vector<8x256xi1>, vector<8x256xi32>
    %cst_83 = arith.constant dense<2147483647> : vector<8xi32>
    %305 = vector.multi_reduction <minsi>, %304, %cst_83 [1] : vector<8x256xi32> to vector<8xi32>
    %306 = vector.shape_cast %305 : vector<8xi32> to vector<8x1xi32>
    %307 = vector.broadcast %306 : vector<8x1xi32> to vector<8x256xi32>
    %308 = arith.cmpi eq, %73, %307 : vector<8x256xi32>
    %c-1_i32_84 = arith.constant -1 : i32
    %309 = vector.broadcast %c-1_i32_84 : i32 to vector<8x256xi32>
    %310 = arith.select %308, %72, %309 : vector<8x256xi1>, vector<8x256xi32>
    %cst_85 = arith.constant dense<-2147483648> : vector<256xi32>
    %311 = vector.multi_reduction <maxsi>, %310, %cst_85 [0] : vector<8x256xi32> to vector<256xi32>
    %312 = vector.shape_cast %311 : vector<256xi32> to vector<1x256xi32>
    %c0_i32_86 = arith.constant 0 : i32
    %313 = vector.broadcast %c0_i32_86 : i32 to vector<1x256xi32>
    %314 = arith.cmpi sge, %312, %313 : vector<1x256xi32>
    %cst_87 = arith.constant 2.000000e+00 : f32
    %315 = vector.broadcast %cst_87 : f32 to vector<1x256xf32>
    %316 = arith.select %314, %315, %292 : vector<1x256xi1>, vector<1x256xf32>
    %317 = arith.select %314, %312, %298 : vector<1x256xi1>, vector<1x256xi32>
    %318 = vector.broadcast %317 : vector<1x256xi32> to vector<8x256xi32>
    %319 = arith.cmpi eq, %318, %72 : vector<8x256xi32>
    %320 = arith.extui %319 : vector<8x256xi1> to vector<8x256xi32>
    %321 = arith.sitofp %320 : vector<8x256xi32> to vector<8x256xf32>
    %c1_88 = arith.constant 1 : index
    %c0_89 = arith.constant 0 : index
    %c0_90 = arith.constant 0 : index
    %322 = vector.load %arg1[%c1_88, %c0_89, %c0_90] : memref<2x16x8xf32, #tpu.memory_space<vmem>>, vector<1x16x8xf32>
    %323 = vector.shape_cast %322 : vector<1x16x8xf32> to vector<16x8xf32>
    %cst_91 = arith.constant dense<0.000000e+00> : vector<16x256xf32>
    %324 = tpu.matmul %323, %321, %cst_91 {dimension_numbers = #tpu.dot_dimension_numbers<[1], [0], [0], [1], [0, 0, 1, 1], [], []>} : vector<16x8xf32>, vector<8x256xf32>, vector<16x256xf32> -> vector<16x256xf32>
    %325 = vector.extract_strided_slice %324 {offsets = [0, 0], sizes = [4, 256], strides = [1, 1]} : vector<16x256xf32> to vector<4x256xf32>
    %326 = vector.extract_strided_slice %324 {offsets = [4, 0], sizes = [10, 256], strides = [1, 1]} : vector<16x256xf32> to vector<10x256xf32>
    %327 = vector.extract_strided_slice %324 {offsets = [14, 0], sizes = [1, 256], strides = [1, 1]} : vector<16x256xf32> to vector<1x256xf32>
    %cst_92 = arith.constant 3.500000e-01 : f32
    %328 = vector.broadcast %cst_92 : f32 to vector<1x256xf32>
    %329 = arith.cmpf olt, %316, %328 : vector<1x256xf32>
    %cst_93 = arith.constant 0.000000e+00 : f32
    %330 = vector.broadcast %cst_93 : f32 to vector<1x256xf32>
    %331 = arith.select %329, %330, %327 : vector<1x256xi1>, vector<1x256xf32>
    %cst_94 = arith.constant 0.000000e+00 : f32
    %332 = vector.broadcast %cst_94 : f32 to vector<1x256xf32>
    %333 = arith.cmpf one, %331, %332 : vector<1x256xf32>
    %cst_95 = arith.constant 0.000000e+00 : f32
    %334 = vector.broadcast %cst_95 : f32 to vector<1x256xf32>
    %335 = arith.cmpf ogt, %331, %334 : vector<1x256xf32>
    %336 = arith.extui %335 : vector<1x256xi1> to vector<1x256xi32>
    %337 = arith.sitofp %336 : vector<1x256xi32> to vector<1x256xf32>
    %cst_96 = arith.constant dense<0.000000e+00> : vector<1xf32>
    %338 = vector.multi_reduction <add>, %337, %cst_96 [1] : vector<1x256xf32> to vector<1xf32>
    %339 = vector.shape_cast %338 : vector<1xf32> to vector<1x1xf32>
    %340 = arith.addf %160, %339 : vector<1x1xf32>
    %341 = vector.extract_strided_slice %325 {offsets = [0, 0], sizes = [1, 256], strides = [1, 1]} : vector<4x256xf32> to vector<1x256xf32>
    %342 = vector.extract_strided_slice %325 {offsets = [2, 0], sizes = [1, 256], strides = [1, 1]} : vector<4x256xf32> to vector<1x256xf32>
    %343 = arith.addf %341, %342 : vector<1x256xf32>
    %cst_97 = arith.constant 5.000000e-01 : f32
    %344 = vector.broadcast %cst_97 : f32 to vector<1x256xf32>
    %345 = arith.mulf %343, %344 : vector<1x256xf32>
    %346 = arith.subf %345, %1 : vector<1x256xf32>
    %347 = arith.mulf %346, %23 : vector<1x256xf32>
    %348 = vector.extract_strided_slice %325 {offsets = [1, 0], sizes = [1, 256], strides = [1, 1]} : vector<4x256xf32> to vector<1x256xf32>
    %349 = vector.extract_strided_slice %325 {offsets = [3, 0], sizes = [1, 256], strides = [1, 1]} : vector<4x256xf32> to vector<1x256xf32>
    %350 = arith.addf %348, %349 : vector<1x256xf32>
    %cst_98 = arith.constant 5.000000e-01 : f32
    %351 = vector.broadcast %cst_98 : f32 to vector<1x256xf32>
    %352 = arith.mulf %350, %351 : vector<1x256xf32>
    %353 = arith.subf %352, %2 : vector<1x256xf32>
    %354 = arith.mulf %353, %25 : vector<1x256xf32>
    %355 = vector.extract_strided_slice %325 {offsets = [2, 0], sizes = [1, 256], strides = [1, 1]} : vector<4x256xf32> to vector<1x256xf32>
    %356 = vector.extract_strided_slice %325 {offsets = [0, 0], sizes = [1, 256], strides = [1, 1]} : vector<4x256xf32> to vector<1x256xf32>
    %357 = arith.subf %355, %356 : vector<1x256xf32>
    %358 = arith.mulf %357, %20 : vector<1x256xf32>
    %359 = math.log %358 : vector<1x256xf32>
    %cst_99 = arith.constant 5.000000e+00 : f32
    %360 = vector.broadcast %cst_99 : f32 to vector<1x256xf32>
    %361 = arith.mulf %359, %360 : vector<1x256xf32>
    %362 = vector.extract_strided_slice %325 {offsets = [3, 0], sizes = [1, 256], strides = [1, 1]} : vector<4x256xf32> to vector<1x256xf32>
    %363 = vector.extract_strided_slice %325 {offsets = [1, 0], sizes = [1, 256], strides = [1, 1]} : vector<4x256xf32> to vector<1x256xf32>
    %364 = arith.subf %362, %363 : vector<1x256xf32>
    %365 = arith.mulf %364, %21 : vector<1x256xf32>
    %366 = math.log %365 : vector<1x256xf32>
    %cst_100 = arith.constant 5.000000e+00 : f32
    %367 = vector.broadcast %cst_100 : f32 to vector<1x256xf32>
    %368 = arith.mulf %366, %367 : vector<1x256xf32>
    %369 = tpu.concatenate %347, %354, %361, %368 in 0 : vector<1x256xf32>, vector<1x256xf32>, vector<1x256xf32>, vector<1x256xf32> -> vector<4x256xf32>
    %c1_101 = arith.constant 1 : index
    %c0_102 = arith.constant 0 : index
    %c0_103 = arith.constant 0 : index
    %370 = vector.load %arg3[%c1_101, %c0_102, %c0_103] : memref<2x4x256xf32, #tpu.memory_space<vmem>>, vector<1x4x256xf32>
    %371 = vector.shape_cast %370 : vector<1x4x256xf32> to vector<4x256xf32>
    %372 = arith.subf %371, %369 : vector<4x256xf32>
    %373 = math.absf %372 : vector<4x256xf32>
    %cst_104 = arith.constant 1.000000e+00 : f32
    %374 = vector.broadcast %cst_104 : f32 to vector<4x256xf32>
    %375 = arith.cmpf olt, %373, %374 : vector<4x256xf32>
    %cst_105 = arith.constant 5.000000e-01 : f32
    %376 = vector.broadcast %cst_105 : f32 to vector<4x256xf32>
    %377 = arith.mulf %376, %372 : vector<4x256xf32>
    %378 = arith.mulf %377, %372 : vector<4x256xf32>
    %cst_106 = arith.constant 5.000000e-01 : f32
    %379 = vector.broadcast %cst_106 : f32 to vector<4x256xf32>
    %380 = arith.subf %373, %379 : vector<4x256xf32>
    %381 = arith.select %375, %378, %380 : vector<4x256xi1>, vector<4x256xf32>
    %cst_107 = arith.constant 0.000000e+00 : f32
    %382 = vector.shape_cast %333 : vector<1x256xi1> to vector<1x256xi1>
    %383 = vector.broadcast %382 : vector<1x256xi1> to vector<4x256xi1>
    %384 = vector.broadcast %cst_107 : f32 to vector<4x256xf32>
    %385 = arith.select %383, %381, %384 : vector<4x256xi1>, vector<4x256xf32>
    %cst_108 = arith.constant dense<0.000000e+00> : vector<4xf32>
    %386 = vector.multi_reduction <add>, %385, %cst_108 [1] : vector<4x256xf32> to vector<4xf32>
    %387 = vector.shape_cast %386 : vector<4xf32> to vector<4x1xf32>
    %cst_109 = arith.constant dense<0.000000e+00> : vector<1xf32>
    %388 = vector.multi_reduction <add>, %387, %cst_109 [0] : vector<4x1xf32> to vector<1xf32>
    %389 = vector.shape_cast %388 : vector<1xf32> to vector<1x1xf32>
    %390 = arith.addf %210, %389 : vector<1x1xf32>
    %391 = arith.subf %326, %51 : vector<10x256xf32>
    %392 = arith.mulf %391, %58 : vector<10x256xf32>
    %c1_110 = arith.constant 1 : index
    %c0_111 = arith.constant 0 : index
    %c0_112 = arith.constant 0 : index
    %393 = vector.load %arg4[%c1_110, %c0_111, %c0_112] : memref<2x10x256xf32, #tpu.memory_space<vmem>>, vector<1x10x256xf32>
    %394 = vector.shape_cast %393 : vector<1x10x256xf32> to vector<10x256xf32>
    %395 = arith.subf %394, %392 : vector<10x256xf32>
    %396 = math.absf %395 : vector<10x256xf32>
    %cst_113 = arith.constant 1.000000e+00 : f32
    %397 = vector.broadcast %cst_113 : f32 to vector<10x256xf32>
    %398 = arith.cmpf olt, %396, %397 : vector<10x256xf32>
    %cst_114 = arith.constant 5.000000e-01 : f32
    %399 = vector.broadcast %cst_114 : f32 to vector<10x256xf32>
    %400 = arith.mulf %399, %395 : vector<10x256xf32>
    %401 = arith.mulf %400, %395 : vector<10x256xf32>
    %cst_115 = arith.constant 5.000000e-01 : f32
    %402 = vector.broadcast %cst_115 : f32 to vector<10x256xf32>
    %403 = arith.subf %396, %402 : vector<10x256xf32>
    %404 = arith.select %398, %401, %403 : vector<10x256xi1>, vector<10x256xf32>
    %cst_116 = arith.constant 0.000000e+00 : f32
    %405 = vector.shape_cast %335 : vector<1x256xi1> to vector<1x256xi1>
    %406 = vector.broadcast %405 : vector<1x256xi1> to vector<10x256xi1>
    %407 = vector.broadcast %cst_116 : f32 to vector<10x256xf32>
    %408 = arith.select %406, %404, %407 : vector<10x256xi1>, vector<10x256xf32>
    %cst_117 = arith.constant dense<0.000000e+00> : vector<10xf32>
    %409 = vector.multi_reduction <add>, %408, %cst_117 [1] : vector<10x256xf32> to vector<10xf32>
    %410 = vector.shape_cast %409 : vector<10xf32> to vector<10x1xf32>
    %cst_118 = arith.constant dense<0.000000e+00> : vector<1xf32>
    %411 = vector.multi_reduction <add>, %410, %cst_118 [0] : vector<10x1xf32> to vector<1xf32>
    %412 = vector.shape_cast %411 : vector<1xf32> to vector<1x1xf32>
    %413 = arith.addf %233, %412 : vector<1x1xf32>
    %414 = vector.broadcast %71 : vector<1x1xf32> to vector<2x256xf32>
    %415 = arith.subf %62, %414 : vector<2x256xf32>
    %416 = math.exp %415 : vector<2x256xf32>
    %cst_119 = arith.constant dense<0.000000e+00> : vector<256xf32>
    %417 = vector.multi_reduction <add>, %416, %cst_119 [0] : vector<2x256xf32> to vector<256xf32>
    %418 = vector.shape_cast %417 : vector<256xf32> to vector<1x256xf32>
    %419 = math.log %418 : vector<1x256xf32>
    %420 = vector.broadcast %71 : vector<1x1xf32> to vector<1x256xf32>
    %421 = arith.addf %419, %420 : vector<1x256xf32>
    %422 = arith.extui %333 : vector<1x256xi1> to vector<1x256xi32>
    %423 = tpu.iota {dimensions = array<i32: 0>} : vector<2x256xi32>
    %424 = vector.broadcast %422 : vector<1x256xi32> to vector<2x256xi32>
    %425 = arith.cmpi eq, %423, %424 : vector<2x256xi32>
    %cst_120 = arith.constant 0.000000e+00 : f32
    %426 = vector.broadcast %cst_120 : f32 to vector<2x256xf32>
    %427 = arith.select %425, %62, %426 : vector<2x256xi1>, vector<2x256xf32>
    %cst_121 = arith.constant dense<0.000000e+00> : vector<256xf32>
    %428 = vector.multi_reduction <add>, %427, %cst_121 [0] : vector<2x256xf32> to vector<256xf32>
    %429 = vector.shape_cast %428 : vector<256xf32> to vector<1x256xf32>
    %430 = arith.subf %421, %429 : vector<1x256xf32>
    %cst_122 = arith.constant 0.000000e+00 : f32
    %431 = vector.broadcast %cst_122 : f32 to vector<1x256xf32>
    %432 = arith.select %333, %431, %430 : vector<1x256xi1>, vector<1x256xf32>
    %c1_123 = arith.constant 1 : index
    %c0_124 = arith.constant 0 : index
    %433 = vector.load %arg8[%c1_123, %c0_124] : memref<2x256xf32, #tpu.memory_space<vmem>>, vector<1x256xf32>
    tpu.vector_store %arg8[%c1_123, %c0_124], %432 {strides = array<i32>} : memref<2x256xf32, #tpu.memory_space<vmem>>, vector<1x256xf32>,
    %434 = arith.extui %333 : vector<1x256xi1> to vector<1x256xi32>
    %435 = arith.sitofp %434 : vector<1x256xi32> to vector<1x256xf32>
    %c1_125 = arith.constant 1 : index
    %c0_126 = arith.constant 0 : index
    %436 = vector.load %arg9[%c1_125, %c0_126] : memref<2x256xf32, #tpu.memory_space<vmem>>, vector<1x256xf32>
    tpu.vector_store %arg9[%c1_125, %c0_126], %435 {strides = array<i32>} : memref<2x256xf32, #tpu.memory_space<vmem>>, vector<1x256xf32>,
    %c0_127 = arith.constant 0 : index
    %c0_128 = arith.constant 0 : index
    %437 = vector.load %arg6[%c0_127, %c0_128] : memref<1x1xf32, #tpu.memory_space<vmem>>, vector<1x1xf32>
    tpu.vector_store %arg6[%c0_127, %c0_128], %390 {strides = array<i32>} : memref<1x1xf32, #tpu.memory_space<vmem>>, vector<1x1xf32>,
    %c0_129 = arith.constant 0 : index
    %c0_130 = arith.constant 0 : index
    %438 = vector.load %arg7[%c0_129, %c0_130] : memref<1x1xf32, #tpu.memory_space<vmem>>, vector<1x1xf32>
    tpu.vector_store %arg7[%c0_129, %c0_130], %413 {strides = array<i32>} : memref<1x1xf32, #tpu.memory_space<vmem>>, vector<1x1xf32>,
    %c0_131 = arith.constant 0 : index
    %c0_132 = arith.constant 0 : index
    %439 = vector.load %arg10[%c0_131, %c0_132] : memref<1x1xf32, #tpu.memory_space<vmem>>, vector<1x1xf32>
    tpu.vector_store %arg10[%c0_131, %c0_132], %340 {strides = array<i32>} : memref<1x1xf32, #tpu.memory_space<vmem>>, vector<1x1xf32>,
    return
  }
}

module attributes {stable_mosaic.version = 11 : i64} {
  func.func @_ce_masked_sum_kernel(%arg0: memref<2x2x256xf32, #tpu.memory_space<vmem>>, %arg1: memref<2x256xf32, #tpu.memory_space<vmem>>, %arg2: memref<2x256xf32, #tpu.memory_space<vmem>>, %arg3: memref<1x1xf32, #tpu.memory_space<vmem>>) attributes {dimension_semantics = [], scalar_prefetch = 0 : i64, scratch_operands = 0 : i64, tpu.core_type = #tpu.core_type<tc>} {
    %cst = arith.constant 0.000000e+00 : f32
    %0 = vector.broadcast %cst : f32 to vector<1x1xf32>
    %c0 = arith.constant 0 : index
    %c0_0 = arith.constant 0 : index
    %c0_1 = arith.constant 0 : index
    %1 = vector.load %arg0[%c0, %c0_0, %c0_1] : memref<2x2x256xf32, #tpu.memory_space<vmem>>, vector<1x2x256xf32>
    %2 = vector.shape_cast %1 : vector<1x2x256xf32> to vector<2x256xf32>
    %cst_2 = arith.constant dense<0xFF800000> : vector<256xf32>
    %3 = vector.multi_reduction <maximumf>, %2, %cst_2 [0] : vector<2x256xf32> to vector<256xf32>
    %4 = vector.shape_cast %3 : vector<256xf32> to vector<1x256xf32>
    %5 = vector.broadcast %4 : vector<1x256xf32> to vector<2x256xf32>
    %6 = arith.subf %2, %5 : vector<2x256xf32>
    %7 = math.exp %6 : vector<2x256xf32>
    %cst_3 = arith.constant dense<0.000000e+00> : vector<256xf32>
    %8 = vector.multi_reduction <add>, %7, %cst_3 [0] : vector<2x256xf32> to vector<256xf32>
    %9 = vector.shape_cast %8 : vector<256xf32> to vector<1x256xf32>
    %10 = math.log %9 : vector<1x256xf32>
    %11 = arith.addf %10, %4 : vector<1x256xf32>
    %c0_4 = arith.constant 0 : index
    %c0_5 = arith.constant 0 : index
    %12 = vector.load %arg1[%c0_4, %c0_5] : memref<2x256xf32, #tpu.memory_space<vmem>>, vector<1x256xf32>
    %cst_6 = arith.constant 0.000000e+00 : f32
    %13 = vector.broadcast %cst_6 : f32 to vector<1x256xf32>
    %14 = arith.cmpf ogt, %12, %13 : vector<1x256xf32>
    %15 = arith.extui %14 : vector<1x256xi1> to vector<1x256xi32>
    %16 = tpu.iota {dimensions = array<i32: 0>} : vector<2x256xi32>
    %17 = vector.broadcast %15 : vector<1x256xi32> to vector<2x256xi32>
    %18 = arith.cmpi eq, %16, %17 : vector<2x256xi32>
    %cst_7 = arith.constant 0.000000e+00 : f32
    %19 = vector.broadcast %cst_7 : f32 to vector<2x256xf32>
    %20 = arith.select %18, %2, %19 : vector<2x256xi1>, vector<2x256xf32>
    %cst_8 = arith.constant dense<0.000000e+00> : vector<256xf32>
    %21 = vector.multi_reduction <add>, %20, %cst_8 [0] : vector<2x256xf32> to vector<256xf32>
    %22 = vector.shape_cast %21 : vector<256xf32> to vector<1x256xf32>
    %c0_9 = arith.constant 0 : index
    %c0_10 = arith.constant 0 : index
    %23 = vector.load %arg2[%c0_9, %c0_10] : memref<2x256xf32, #tpu.memory_space<vmem>>, vector<1x256xf32>
    %cst_11 = arith.constant 0.000000e+00 : f32
    %24 = vector.broadcast %cst_11 : f32 to vector<1x256xf32>
    %25 = arith.cmpf ogt, %23, %24 : vector<1x256xf32>
    %26 = arith.subf %11, %22 : vector<1x256xf32>
    %cst_12 = arith.constant 0.000000e+00 : f32
    %27 = vector.broadcast %cst_12 : f32 to vector<1x256xf32>
    %28 = arith.select %25, %26, %27 : vector<1x256xi1>, vector<1x256xf32>
    %cst_13 = arith.constant dense<0.000000e+00> : vector<1xf32>
    %29 = vector.multi_reduction <add>, %28, %cst_13 [1] : vector<1x256xf32> to vector<1xf32>
    %30 = vector.shape_cast %29 : vector<1xf32> to vector<1x1xf32>
    %31 = arith.addf %0, %30 : vector<1x1xf32>
    %c1 = arith.constant 1 : index
    %c0_14 = arith.constant 0 : index
    %c0_15 = arith.constant 0 : index
    %32 = vector.load %arg0[%c1, %c0_14, %c0_15] : memref<2x2x256xf32, #tpu.memory_space<vmem>>, vector<1x2x256xf32>
    %33 = vector.shape_cast %32 : vector<1x2x256xf32> to vector<2x256xf32>
    %cst_16 = arith.constant dense<0xFF800000> : vector<256xf32>
    %34 = vector.multi_reduction <maximumf>, %33, %cst_16 [0] : vector<2x256xf32> to vector<256xf32>
    %35 = vector.shape_cast %34 : vector<256xf32> to vector<1x256xf32>
    %36 = vector.broadcast %35 : vector<1x256xf32> to vector<2x256xf32>
    %37 = arith.subf %33, %36 : vector<2x256xf32>
    %38 = math.exp %37 : vector<2x256xf32>
    %cst_17 = arith.constant dense<0.000000e+00> : vector<256xf32>
    %39 = vector.multi_reduction <add>, %38, %cst_17 [0] : vector<2x256xf32> to vector<256xf32>
    %40 = vector.shape_cast %39 : vector<256xf32> to vector<1x256xf32>
    %41 = math.log %40 : vector<1x256xf32>
    %42 = arith.addf %41, %35 : vector<1x256xf32>
    %c1_18 = arith.constant 1 : index
    %c0_19 = arith.constant 0 : index
    %43 = vector.load %arg1[%c1_18, %c0_19] : memref<2x256xf32, #tpu.memory_space<vmem>>, vector<1x256xf32>
    %cst_20 = arith.constant 0.000000e+00 : f32
    %44 = vector.broadcast %cst_20 : f32 to vector<1x256xf32>
    %45 = arith.cmpf ogt, %43, %44 : vector<1x256xf32>
    %46 = arith.extui %45 : vector<1x256xi1> to vector<1x256xi32>
    %47 = tpu.iota {dimensions = array<i32: 0>} : vector<2x256xi32>
    %48 = vector.broadcast %46 : vector<1x256xi32> to vector<2x256xi32>
    %49 = arith.cmpi eq, %47, %48 : vector<2x256xi32>
    %cst_21 = arith.constant 0.000000e+00 : f32
    %50 = vector.broadcast %cst_21 : f32 to vector<2x256xf32>
    %51 = arith.select %49, %33, %50 : vector<2x256xi1>, vector<2x256xf32>
    %cst_22 = arith.constant dense<0.000000e+00> : vector<256xf32>
    %52 = vector.multi_reduction <add>, %51, %cst_22 [0] : vector<2x256xf32> to vector<256xf32>
    %53 = vector.shape_cast %52 : vector<256xf32> to vector<1x256xf32>
    %c1_23 = arith.constant 1 : index
    %c0_24 = arith.constant 0 : index
    %54 = vector.load %arg2[%c1_23, %c0_24] : memref<2x256xf32, #tpu.memory_space<vmem>>, vector<1x256xf32>
    %cst_25 = arith.constant 0.000000e+00 : f32
    %55 = vector.broadcast %cst_25 : f32 to vector<1x256xf32>
    %56 = arith.cmpf ogt, %54, %55 : vector<1x256xf32>
    %57 = arith.subf %42, %53 : vector<1x256xf32>
    %cst_26 = arith.constant 0.000000e+00 : f32
    %58 = vector.broadcast %cst_26 : f32 to vector<1x256xf32>
    %59 = arith.select %56, %57, %58 : vector<1x256xi1>, vector<1x256xf32>
    %cst_27 = arith.constant dense<0.000000e+00> : vector<1xf32>
    %60 = vector.multi_reduction <add>, %59, %cst_27 [1] : vector<1x256xf32> to vector<1xf32>
    %61 = vector.shape_cast %60 : vector<1xf32> to vector<1x1xf32>
    %62 = arith.addf %31, %61 : vector<1x1xf32>
    %c0_28 = arith.constant 0 : index
    %c0_29 = arith.constant 0 : index
    %63 = vector.load %arg3[%c0_28, %c0_29] : memref<1x1xf32, #tpu.memory_space<vmem>>, vector<1x1xf32>
    tpu.vector_store %arg3[%c0_28, %c0_29], %62 {strides = array<i32>} : memref<1x1xf32, #tpu.memory_space<vmem>>, vector<1x1xf32>,
    return
  }
}

</mosaic_0001>

<bundles_post_ra>
// kernel: neg.1
= control target key start
LH: loop header
LB: loop body
LE: loop exit
PB: predicated region body
PF: predicated region fallthrough
CT: control target
= control target key end

     0   :  { %s40_s0 = inlined_call_operand.vmem [shape: f32[2,256], index: 0, kind: input, shape index: {}]   ;;  %s41_s1 = inlined_call_operand.vmem [shape: f32[2,256], index: 1, kind: output, shape index: {}]  }
   0x1   :  { %v2_v0 = vld [vmem:[%s40_s0] sm:$0x3]  ;;  %v16_v1 = vld [vmem:[%s40_s0 + $0x2] sm:$0x3] }
   0x2   :  { %v5_v2 = vxor.u32 2147483648, %v2_v0  ;;  %v12_v3 = vxor.u32 2147483648, %v16_v1 }
   0x4   :  { %7 = vst [vmem:[%s41_s1] sm:$0x3] %v5_v2  ;;  %17 = vst [vmem:[%s41_s1 + $0x2] sm:$0x3] %v12_v3 }

// kernel: multibox_loss.3
= control target key start
LH: loop header
LB: loop body
LE: loop exit
PB: predicated region body
PF: predicated region fallthrough
CT: control target
= control target key end

     0   :  { %v20_v0 = vlaneseq  ;;  %v359_v1 = vmov 1983009808   ;;  %s506_s0 = inlined_call_operand.vmem [shape: f32[2,2,256], index: 0, kind: input, shape index: {}]   ;;  %s507_s1 = inlined_call_operand.vmem [shape: f32[2,256], index: 1, kind: input, shape index: {}]   ;;  %s508_s2 = inlined_call_operand.vmem [shape: f32[2,256], index: 2, kind: input, shape index: {}]   ;;  %s509_s3 = inlined_call_operand.hbm [shape: f32[1,1], index: 3, kind: output, shape index: {}]  }
   0x1   :  { %v18_v2 = vunpack.c.l.s4 %v359_v1  ;;  %v15_v5 = vld [vmem:[%s506_s0] sm:$0xf]  ;;  %v318_v6 = vld [vmem:[%s506_s0 + $0x4] sm:$0xf] }
   0x2   :  { %v383_v3 = vshrl.u32 %v20_v0, 7 }
   0x3   :  { %v19_v4 = vunpack.c.0.s8 %v18_v2 }
   0x5   :  { %v392_v7 = vsub.s32 %v19_v4, %v383_v3 }
   0x6   :  { %8 = vsyncpa [#allocation3], 0  ;;  %vm27_vm0 = vcmask 1041408   ;;  %v87_v48 = vld [vmem:[%s507_s1] ss:$2 sm:$0x3] }
   0x7   :  { %v395_v8 = vrot.slane %v15_v5, %v392_v7  ;;  %v398_v9 = vrot.slane %v318_v6, %v392_v7  ;;  %v319_v49 = vld [vmem:[%s507_s1 + $0x1] ss:$2 sm:$0x3]  ;;  %vm88_vm1 = vcmp.gt.f32.partialorder %v87_v48, 0.0  ;;  %v437_v50 = vsub.s32 0, %v383_v3 }
   0x8   :  { %vm233_vm2 = vcmp.gt.f32.partialorder %v319_v49, 0.0  ;;  %v360_v51 = vmov 0   ;;  %v440_v53 = vsub.s32 1, %v383_v3  ;;  %v361_v4 = vmov 1966171168  }
   0x9   :  { %v402_v10 = vcombine.high %v395_v8, %v395_v8  ;;  %v28_v11 = vsel %vm27_vm0, %v395_v8, -inf  ;;  %v408_v12 = vcombine.high %v398_v9, %v398_v9  ;;  %v172_v14 = vsel %vm27_vm0, %v398_v9, -inf }
   0xa   :  { %v29_v13 = vrot.slane %v28_v11, 4  ;;  %v173_v16 = vrot.slane %v172_v14, 4  ;;  %v89_v52 = vsel %vm88_vm1, 1, %v360_v51  ;;  %v234_v54 = vsel %vm233_vm2, 1, %v360_v51 }
   0xb   :  { %v35_v15 = vsel %vm27_vm0, %v402_v10, -inf  ;;  %v179_v19 = vsel %vm27_vm0, %v408_v12, -inf  ;;  %v95_v55 = vrot.slane %v89_v52, %v437_v50  ;;  %v238_v56 = vrot.slane %v234_v54, %v437_v50 }
   0xc   :  { %v30_v17 = vmax.f32 %v28_v11, %v29_v13  ;;  %v36_v18 = vrot.slane %v35_v15, 4  ;;  %v174_v20 = vmax.f32 %v172_v14, %v173_v16  ;;  %v180_v21 = vrot.slane %v179_v19, 4 }
   0xd   :  { %v99_v57 = vrot.slane %v89_v52, %v440_v53  ;;  %v242_v58 = vrot.slane %v234_v54, %v440_v53  ;;  %vm448_vm3 = vcmp.eq.s32.totalorder %v383_v3, %v95_v55  ;;  %vm453_vm4 = vcmp.eq.s32.totalorder %v383_v3, %v238_v56 }
   0xe   :  { %v31_v22 = vrot.slane %v30_v17, 2  ;;  %v37_v23 = vmax.f32 %v35_v15, %v36_v18  ;;  %v175_v24 = vrot.slane %v174_v20, 2  ;;  %v181_v25 = vmax.f32 %v179_v19, %v180_v21 }
   0xf   :  { %vm460_vm5 = vcmp.eq.s32.totalorder %v383_v3, %v99_v57  ;;  %vm465_vm6 = vcmp.eq.s32.totalorder %v383_v3, %v242_v58  ;;  %v102_v11 = vsel %vm448_vm3, %v395_v8, 0.0  ;;  %v245_v16 = vsel %vm453_vm4, %v398_v9, 0.0 }
  0x10   :  { %v32_v26 = vmax.f32 %v30_v17, %v31_v22  ;;  %v38_v27 = vrot.slane %v37_v23, 2  ;;  %v176_v28 = vmax.f32 %v174_v20, %v175_v24  ;;  %v182_v29 = vrot.slane %v181_v25, 2 }
  0x11   :  { %v103_v19 = vsel %vm460_vm5, %v402_v10, 0.0  ;;  %v104_v8 = vsel %vm27_vm0, %v102_v11, 0.0  ;;  %v247_v9 = vsel %vm27_vm0, %v245_v16, 0.0  ;;  %vm152_vm9 = vcmask 1040384  }
  0x12   :  { %v33_v30 = vrot.slane %v32_v26, 1  ;;  %v39_v31 = vmax.f32 %v37_v23, %v38_v27  ;;  %v177_v32 = vrot.slane %v176_v28, 1  ;;  %v183_v33 = vmax.f32 %v181_v25, %v182_v29 }
  0x13   :  { %v246_v23 = vsel %vm465_vm6, %v408_v12, 0.0  ;;  %vm302_vm10 = vcmask 0  }
  0x14   :  { %v416_v34 = vmax.f32 %v32_v26, %v33_v30  ;;  %v40_v35 = vrot.slane %v39_v31, 1  ;;  %v418_v36 = vmax.f32 %v176_v28, %v177_v32  ;;  %v184_v37 = vrot.slane %v183_v33, 1 }
  0x15   :  { %v111_v26 = vsel %vm27_vm0, %v103_v19, 0.0  ;;  %v105_v30 = vrot.slane %v104_v8, 4 }
  0x16   :  { %v420_v38 = vmax.f32 %v39_v31, %v40_v35  ;;  %v422_v39 = vmax.f32 %v183_v33, %v184_v37  ;;  %v254_v31 = vsel %vm27_vm0, %v246_v23, 0.0  ;;  %v248_v35 = vrot.slane %v247_v9, 4 }
  0x18   :  { %v44_v40 = vcombine.low %v416_v34, %v420_v38  ;;  %v188_v41 = vcombine.low %v418_v36, %v422_v39  ;;  %v249_v49 = vadd.f32 %v248_v35, %v247_v9 }
  0x1a   :  { %v51_v42 = vrot.slane %v44_v40, %v392_v7  ;;  %v195_v43 = vrot.slane %v188_v41, %v392_v7  ;;  %v112_v41 = vrot.slane %v111_v26, 4  ;;  %v250_v57 = vrot.slane %v249_v49, 2 }
  0x1c   :  { %v53_v44 = vsub.f32 %v15_v5, %v51_v42  ;;  %v197_v45 = vsub.f32 %v318_v6, %v195_v43  ;;  %v255_v43 = vrot.slane %v254_v31, 4  ;;  %v113_v52 = vadd.f32 %v112_v41, %v111_v26 }
  0x1d   :  { %v126_v5 = vunpack.c.l.s4 %v361_v4 }
  0x1e   :  { %v54_v46 = vmul.f32 1.442695, %v53_v44  ;;  %v198_v47 = vmul.f32 1.442695, %v197_v45  ;;  %v256_v55 = vadd.f32 %v255_v43, %v254_v31  ;;  %v114_v58 = vrot.slane %v113_v52, 2 }
  0x20   :  { %325 = vpow2.f32 %v54_v46  ;;  %v106_v46 = vadd.f32 %v105_v30, %v104_v8  ;;  %v115_v62 = vadd.f32 %v114_v58, %v113_v52 }
  0x21   :  { %327 = vpow2.f32 %v198_v47 }
  0x22   :  { %v107_v56 = vrot.slane %v106_v46, 2 }
  0x2d   :  { %v326_v59 = vpop.eup %325 }
  0x2e   :  { %v328_v60 = vpop.eup %327  ;;  %v63_v61 = vrot.slane %v326_v59, %v392_v7  ;;  %v257_v59 = vrot.slane %v256_v55, 2 }
  0x2f   :  { %v207_v0 = vrot.slane %v328_v60, %v392_v7  ;;  %v108_v60 = vadd.f32 %v107_v56, %v106_v46 }
  0x30   :  { %v64_v1 = vcombine.high %v63_v61, %v63_v61  ;;  %v67_v2 = vsel %vm27_vm0, %v63_v61, 0.0  ;;  %v251_v61 = vadd.f32 %v250_v57, %v249_v49  ;;  %v258_v63 = vadd.f32 %v257_v59, %v256_v55 }
  0x31   :  { %v68_v6 = vrot.slane %v67_v2, 4  ;;  %v208_v13 = vcombine.high %v207_v0, %v207_v0  ;;  %v211_v7 = vsel %vm27_vm0, %v207_v0, 0.0  ;;  %v109_v0 = vrot.slane %v108_v60, 1 }
  0x32   :  { %v74_v14 = vsel %vm27_vm0, %v64_v1, 0.0  ;;  %v212_v15 = vrot.slane %v211_v7, 4  ;;  %v252_v1 = vrot.slane %v251_v61, 1  ;;  %v259_v11 = vrot.slane %v258_v63, 1 }
  0x33   :  { %v69_v17 = vadd.f32 %v68_v6, %v67_v2  ;;  %v75_v18 = vrot.slane %v74_v14, 4  ;;  %v218_v20 = vsel %vm27_vm0, %v208_v13, 0.0  ;;  %v116_v2 = vrot.slane %v115_v62, 1 }
  0x34   :  { %v213_v21 = vadd.f32 %v212_v15, %v211_v7  ;;  %v219_v22 = vrot.slane %v218_v20, 4 }
  0x35   :  { %v70_v24 = vrot.slane %v69_v17, 2  ;;  %v76_v25 = vadd.f32 %v75_v18, %v74_v14  ;;  %v110_v14 = vadd.f32 %v109_v0, %v108_v60  ;;  %v117_v8 = vadd.f32 %v116_v2, %v115_v62 }
  0x36   :  { %v214_v27 = vrot.slane %v213_v21, 2  ;;  %v220_v28 = vadd.f32 %v219_v22, %v218_v20 }
  0x37   :  { %v71_v29 = vadd.f32 %v70_v24, %v69_v17  ;;  %v77_v10 = vrot.slane %v76_v25, 2  ;;  %v253_v17 = vadd.f32 %v252_v1, %v251_v61  ;;  %v260_v24 = vadd.f32 %v259_v11, %v258_v63 }
  0x38   :  { %v215_v32 = vadd.f32 %v214_v27, %v213_v21  ;;  %v221_v33 = vrot.slane %v220_v28, 2  ;;  %v127_v21 = vunpack.c.0.s8 %v126_v5 }
  0x39   :  { %v72_v37 = vrot.slane %v71_v29, 1  ;;  %v78_v40 = vadd.f32 %v77_v10, %v76_v25 }
  0x3a   :  { %v216_v12 = vrot.slane %v215_v32, 1  ;;  %v222_v42 = vadd.f32 %v221_v33, %v220_v28 }
  0x3b   :  { %v73_v44 = vadd.f32 %v72_v37, %v71_v29  ;;  %v79_v45 = vrot.slane %v78_v40, 1  ;;  %v130_v29 = vsub.s32 %v127_v21, %v383_v3 }
  0x3c   :  { %v217_v47 = vadd.f32 %v216_v12, %v215_v32  ;;  %v223_v48 = vrot.slane %v222_v42, 1 }
  0x3d   :  { %v80_v51 = vadd.f32 %v79_v45, %v78_v40  ;;  %329 = vlog2.f32 %v73_v44 }
  0x3e   :  { %v224_v54 = vadd.f32 %v223_v48, %v222_v42  ;;  %331 = vlog2.f32 %v217_v47 }
  0x3f   :  { %333 = vlog2.f32 %v80_v51 }
  0x40   :  { %335 = vlog2.f32 %v224_v54 }
  0x4a   :  { %v330_v6 = vpop.eup %329 }
  0x4b   :  { %v332_v13 = vpop.eup %331  ;;  %v82_v7 = vmul.f32 0.6931472, %v330_v6 }
  0x4c   :  { %v334_v15 = vpop.eup %333  ;;  %v226_v16 = vmul.f32 0.6931472, %v332_v13 }
  0x4d   :  { %v336_v18 = vpop.eup %335  ;;  %v84_v19 = vmul.f32 0.6931472, %v334_v15  ;;  %v85_v20 = vadd.f32 %v82_v7, %v416_v34  ;;  %v118_v34 = vld [vmem:[%s508_s2] ss:$2 sm:$0x3] }
  0x4e   :  { %v228_v22 = vmul.f32 0.6931472, %v336_v18  ;;  %v229_v23 = vadd.f32 %v226_v16, %v418_v36  ;;  %v320_v36 = vld [vmem:[%s508_s2 + $0x1] ss:$2 sm:$0x3]  ;;  %vm119_vm7 = vcmp.gt.f32.partialorder %v118_v34, 0.0 }
  0x4f   :  { %v86_v25 = vadd.f32 %v84_v19, %v420_v38  ;;  %v120_v9 = vsub.f32 %v85_v20, %v110_v14  ;;  %vm263_vm8 = vcmp.gt.f32.partialorder %v320_v36, 0.0  ;;  %s362_s2 = smov [#allocation2]  }
  0x50   :  { %v230_v26 = vadd.f32 %v228_v22, %v422_v39  ;;  %v264_v27 = vsub.f32 %v229_v23, %v253_v17  ;;  %s310_s22 = sshll.u32 %s362_s2, 4  ;;  %s311_s22 = int_to_ptr.vmem [resolvable:$true] %s310_s22 }
  0x51   :  { %v121_v28 = vsub.f32 %v86_v25, %v117_v8  ;;  %s337_s23 = scalar_lea.vmem %s311_s22, 16  ;;  %s341_s24 = scalar_lea.vmem %s311_s22, 32 }
  0x52   :  { %v265_v10 = vsub.f32 %v230_v26, %v260_v24  ;;  %p338_p0 = scmp.ne.s32.totalorder %s311_s22, %s337_s23  ;;  %p342_p1 = scmp.lt.s32.totalorder %s311_s22, %s311_s22 }
  0x53   :  { %v124_v30 = vcombine.low %v120_v9, %v121_v28  ;;  %p343_p2 = scmp.lt.s32.totalorder %s341_s24, %s337_s23 }
  0x54   :  { %v268_v31 = vcombine.low %v264_v27, %v265_v10 }
  0x55   :  { %v131_v32 = vrot.slane %v124_v30, %v130_v29  ;;  %p344_p3 = por %p343_p2, %p342_p1 }
  0x56   :  { %v275_v38 = vrot.slane %v268_v31, %v130_v29 }
  0x57   :  { %v138_v33 = vrot.slane %v131_v32, %v130_v29  ;;  %p345_p4 = pnand %p344_p3, %p338_p0 }
  0x58   :  { %v282_v39 = vrot.slane %v275_v38, %v130_v29 }
  0x59   :  { %v140_v35 = vsel %vm119_vm7, %v138_v33, 0.0 }
  0x5a   :  { %v145_v3 = vrot.slane %v140_v35, %v437_v50  ;;  %v149_v37 = vrot.slane %v140_v35, %v440_v53  ;;  %v284_v40 = vsel %vm263_vm8, %v282_v39, 0.0 }
  0x5b   :  { %v289_v41 = vrot.slane %v284_v40, %v437_v50  ;;  %v293_v12 = vrot.slane %v284_v40, %v440_v53 }
  0x5c   :  { %v153_v42 = vsel %vm152_vm9, %v145_v3, 0.0  ;;  %v154_v43 = vsel %vm152_vm9, %v149_v37, 0.0 }
  0x5d   :  { %v155_v44 = vadd.f32 %v154_v43, %v153_v42  ;;  %v296_v45 = vsel %vm152_vm9, %v289_v41, 0.0  ;;  %v297_v46 = vsel %vm152_vm9, %v293_v12, 0.0 }
  0x5e   :  { %v298_v47 = vadd.f32 %v297_v46, %v296_v45 }
  0x5f   :  { %156 = vadd.xlane.f32.xlu0 %v155_v44 }
  0x63   :  { %299 = vadd.xlane.f32.xlu0 %v298_v47 }
  0xe8   :  { %v157_v48 = vpop.xlane.xlu0 %156 }
  0xec   :  { %v300_v49 = vpop.xlane.xlu0 %299 }
  0xed   :  { %v301_v51 = vadd.f32 %v300_v49, %v157_v48 }
  0xef   :  { %303 = vst.msk [vmem:[#allocation2] sm:$0x1] %vm302_vm10, %v301_v51 }
  0xf0   :  { %348 = shalt.err (!%p345_p4)
}
  0xf1   :  { %313 = dma.vmem_to_hbm [thread:$0]  %s311_s22, 16, %s509_s3, [#allocation3]  }
  0xf2   :  { %357 = dma.done.wait [#allocation3], 16  }
  0xf3   :  { %358 = vsyncadd [#allocation3], 4294967280 }
  0xf4   :  { %317 = vsyncpa [#allocation3], 1 }

// kernel: multibox_loss.2
= control target key start
LH: loop header
LB: loop body
LE: loop exit
PB: predicated region body
PF: predicated region fallthrough
CT: control target
= control target key end

     0   :  { %16 = vsyncpa [#allocation3], 0  ;;  %s1639_s15 = smov 2   ;;  %v2572_v1 = vmov 0   ;;  %s2561_s0 = inlined_call_operand.vmem [shape: f32[2,8,4], index: 0, kind: input, shape index: {}]   ;;  %s2562_s1 = inlined_call_operand.vmem [shape: f32[2,16,8], index: 1, kind: input, shape index: {}]   ;;  %s2563_s2 = inlined_call_operand.vmem [shape: f32[4,256], index: 2, kind: input, shape index: {}]   ;;  %s2564_s3 = inlined_call_operand.vmem [shape: f32[2,4,256], index: 3, kind: input, shape index: {}]   ;;  %s2565_s4 = inlined_call_operand.vmem [shape: f32[2,10,256], index: 4, kind: input, shape index: {}]   ;;  %s2566_s5 = inlined_call_operand.vmem [shape: f32[2,2,256], index: 5, kind: input, shape index: {}]   ;;  %s2567_s6 = inlined_call_operand.hbm [shape: f32[1,1], index: 6, kind: output, shape index: {0}]   ;;  %s2568_s7 = inlined_call_operand.hbm [shape: f32[1,1], index: 7, kind: output, shape index: {1}]   ;;  %s2569_s8 = inlined_call_operand.vmem [shape: f32[2,256], index: 8, kind: output, shape index: {2}]   ;;  %s2570_s9 = inlined_call_operand.vmem [shape: f32[2,256], index: 9, kind: output, shape index: {3}]   ;;  %s2571_s10 = inlined_call_operand.hbm [shape: f32[1,1], index: 10, kind: output, shape index: {4}]  }
   0x1   :  { %v215_v0 = vld [vmem:[%s2561_s0] sm:$0xff]  ;;  %1528 = vset.pattern.permute.xlu1 %v2572_v1 }
   0x2   :  { %325 = vrot.lane.b32.xlu0 %v215_v0, %s1639_s15 }
   0x3   :  { %17 = vsyncpa [#allocation5], 0  ;;  %v1489_v2 = vld [vmem:[%s2561_s0 + $0x8] sm:$0xff]  ;;  %v1641_v3 = vmov 2   ;;  %v1642_v4 = vmov 1   ;;  %v1643_v5 = vmov 3   ;;  %v46_v17 = vlaneseq }
   0x4   :  { %1527 = vset.pattern.permute.xlu0 %v1641_v3  ;;  %s1644_s18 = smov 127   ;;  %v1718_v14 = vld [vmem:[%s2563_s2] sm:$0xff]  ;;  %vm175_vm8 = vcmask 1041408   ;;  %s1650_s11 = smov [#allocation6]  }
   0x5   :  { %v31_v15 = vmul.f32 0.5, %v1718_v14  ;;  %v1722_v19 = vshrl.u32 %v46_v17, 7  ;;  %s1453_s12 = sshll.u32 %s1650_s11, 4  ;;  %s1454_s12 = int_to_ptr.vmem [resolvable:$true] %s1453_s12 }
   0x6   :  { %926 = vrot.lane.b32.xlu0 %v1489_v2, %s1639_s15 }
   0x7   :  { %v33_v18 = vrot.slane %v31_v15, 6  ;;  %v1725_v22 = vsub.s32 0, %v1722_v19  ;;  %v1729_v24 = vsub.s32 4, %v1722_v19  ;;  %v1733_v26 = vsub.s32 1, %v1722_v19 }
   0x8   :  { %v1736_v27 = vsub.s32 5, %v1722_v19 }
   0x9   :  { %v34_v20 = vrot.slane %v33_v18, 4 }
   0xa   :  { %218 = vperm.xlu0 %1527, %v215_v0  }
   0xb   :  { %v36_v23 = vsub.f32 %v1718_v14, %v34_v20  ;;  %v37_v25 = vadd.f32 %v34_v20, %v1718_v14 }
   0xd   :  { %v225_v30 = vrot.slane %v37_v25, %v1725_v22  ;;  %v229_v31 = vrot.slane %v37_v25, %v1729_v24  ;;  %v302_v32 = vrot.slane %v36_v23, %v1733_v26  ;;  %v250_v33 = vrot.slane %v36_v23, %v1725_v22 }
   0xe   :  { %1530 = vset.pattern.permute.xlu0 %v1642_v4  ;;  %v254_v34 = vrot.slane %v36_v23, %v1729_v24  ;;  %v278_v35 = vrot.slane %v37_v25, %v1733_v26  ;;  %v38_v36 = vsub.f32 %v37_v25, %v36_v23  ;;  %v282_v37 = vrot.slane %v37_v25, %v1736_v27 }
   0xf   :  { %296 = vperm.xlu0 %1530, %v215_v0   ;;  %v306_v38 = vrot.slane %v36_v23, %v1736_v27  ;;  %v235_v39 = vrot.slane %v225_v30, %v1725_v22  ;;  %v239_v40 = vrot.slane %v229_v31, %v1725_v22  ;;  %v312_v41 = vrot.slane %v302_v32, %v1733_v26 }
  0x10   :  { %v260_v42 = vrot.slane %v250_v33, %v1725_v22  ;;  %v264_v43 = vrot.slane %v254_v34, %v1725_v22  ;;  %v288_v44 = vrot.slane %v278_v35, %v1733_v26  ;;  %v1472_v47 = vrot.slane %v38_v36, 9 }
  0x11   :  { %v292_v48 = vrot.slane %v282_v37, %v1733_v26  ;;  %v316_v49 = vrot.slane %v306_v38, %v1733_v26 }
  0x12   :  { %v43_v57 = vmul.f32 %v1472_v47, %v38_v36 }
  0x13   :  { %1533 = vset.pattern.permute.xlu0 %v1643_v5 }
  0x14   :  { %909 = vperm.xlu0 %1533, %v1489_v2  }
  0x18   :  { %1536 = vset.pattern.permute.xlu0 %v1641_v3 }
  0x74   :  { %v326_v6 = vpop.permute.xlu0 %325 }
  0x75   :  { %v328_v7 = vsub.f32 %v215_v0, %v326_v6 }
  0x77   :  { %330 = vrot.lane.b32.xlu1 %v328_v7, %s1644_s18 }
  0x78   :  { %v927_v8 = vpop.permute.xlu0 %926 }
  0x79   :  { %v929_v9 = vsub.f32 %v1489_v2, %v927_v8 }
  0x7b   :  { %931 = vrot.lane.b32.xlu1 %v929_v9, %s1644_s18 }
  0x7f   :  { %243 = vperm.xlu1 %1528, %v215_v0  }
  0x83   :  { %1529 = vset.pattern.permute.xlu1 %v1643_v5 }
  0x84   :  { %272 = vperm.xlu1 %1529, %v215_v0  }
  0x85   :  { %v219_v28 = vpop.permute.xlu0 %218 }
  0x86   :  { %v240_v50 = vmin.f32 %v219_v28, %v235_v39  ;;  %v241_v51 = vmin.f32 %v219_v28, %v239_v40 }
  0x88   :  { %1531 = vset.pattern.permute.xlu1 %v1641_v3 }
  0x89   :  { %893 = vperm.xlu1 %1531, %v1489_v2  }
  0x8a   :  { %v297_v45 = vpop.permute.xlu0 %296 }
  0x8b   :  { %v317_v52 = vmax.f32 %v297_v45, %v312_v41  ;;  %v318_v59 = vmax.f32 %v297_v45, %v316_v49 }
  0x8d   :  { %1532 = vset.pattern.permute.xlu1 %v2572_v1 }
  0x8e   :  { %899 = vperm.xlu1 %1532, %v1489_v2  }
  0x8f   :  { %v910_v56 = vpop.permute.xlu0 %909 }
  0x90   :  { %v912_v61 = vmin.f32 %v910_v56, %v288_v44  ;;  %v913_v62 = vmin.f32 %v910_v56, %v292_v48 }
  0x92   :  { %1534 = vset.pattern.permute.xlu1 %v1642_v4 }
  0x93   :  { %915 = vperm.xlu1 %1534, %v1489_v2  }
  0x97   :  { %1535 = vset.pattern.permute.xlu1 %v1641_v3  ;;  %v343_v3 = vrot.slane %v43_v57, %v1725_v22 }
  0x99   :  { %v353_v25 = vrot.slane %v343_v3, %v1725_v22 }
  0xe9   :  { %v331_v10 = vpop.permute.xlu1 %330 }
  0xea   :  { %v333_v11 = vmul.f32 %v331_v10, %v328_v7 }
  0xec   :  { %336 = vperm.xlu1 %1535, %v333_v11   ;;  %v347_v11 = vrot.slane %v43_v57, %v1729_v24  ;;  %v1771_v57 = vand.u32 127, %v46_v17 }
  0xed   :  { %v932_v12 = vpop.permute.xlu1 %931 }
  0xee   :  { %v934_v13 = vmul.f32 %v932_v12, %v929_v9  ;;  %v357_v28 = vrot.slane %v347_v11, %v1725_v22 }
  0xf0   :  { %937 = vperm.xlu0 %1536, %v934_v13  }
  0xfa   :  { %v244_v16 = vpop.permute.xlu1 %243 }
  0xfb   :  { %v265_v53 = vmax.f32 %v244_v16, %v260_v42  ;;  %v266_v54 = vmax.f32 %v244_v16, %v264_v43 }
  0xfd   :  { %v267_v63 = vsub.f32 %v240_v50, %v265_v53  ;;  %v268_v0 = vsub.f32 %v241_v51, %v266_v54 }
  0xff   :  { %v273_v21 = vpop.permute.xlu1 %272  ;;  %v269_v12 = vmax.f32 %v267_v63, 0.0  ;;  %v270_v13 = vmax.f32 %v268_v0, 0.0 }
 0x100   :  { %v293_v55 = vmin.f32 %v273_v21, %v288_v44  ;;  %v294_v58 = vmin.f32 %v273_v21, %v292_v48 }
 0x102   :  { %v319_v2 = vsub.f32 %v293_v55, %v317_v52  ;;  %v320_v4 = vsub.f32 %v294_v58, %v318_v59  ;;  %v1774_v58 = vadd.s32 128, %v1771_v57 }
 0x104   :  { %v894_v29 = vpop.permute.xlu1 %893  ;;  %v321_v15 = vmax.f32 %v319_v2, 0.0  ;;  %v322_v16 = vmax.f32 %v320_v4, 0.0 }
 0x105   :  { %v896_v5 = vmin.f32 %v894_v29, %v235_v39  ;;  %v897_v8 = vmin.f32 %v894_v29, %v239_v40 }
 0x106   :  { %v323_v29 = vmul.f32 %v321_v15, %v269_v12  ;;  %v324_v33 = vmul.f32 %v322_v16, %v270_v13 }
 0x109   :  { %v900_v46 = vpop.permute.xlu1 %899 }
 0x10a   :  { %v902_v6 = vmax.f32 %v900_v46, %v260_v42  ;;  %v903_v9 = vmax.f32 %v900_v46, %v264_v43 }
 0x10c   :  { %v904_v18 = vsub.f32 %v896_v5, %v902_v6  ;;  %v905_v21 = vsub.f32 %v897_v8, %v903_v9 }
 0x10e   :  { %v916_v60 = vpop.permute.xlu1 %915  ;;  %v906_v30 = vmax.f32 %v904_v18, 0.0  ;;  %v907_v34 = vmax.f32 %v905_v21, 0.0  ;;  %v2574_v18 = vmov 0.0  }
 0x10f   :  { %v918_v7 = vmax.f32 %v916_v60, %v312_v41  ;;  %v919_v10 = vmax.f32 %v916_v60, %v316_v49  ;;  %530 = vmatprep.mubr.f32.mxu0 %v2574_v18  ;;  %1112 = vmatprep.mubr.f32.mxu1 %v2574_v18 }
 0x111   :  { %v920_v20 = vsub.f32 %v912_v61, %v918_v7  ;;  %v921_v23 = vsub.f32 %v913_v62, %v919_v10 }
 0x113   :  { %v922_v31 = vmax.f32 %v920_v20, 0.0  ;;  %v923_v35 = vmax.f32 %v921_v23, 0.0  ;;  %v1646_v20 = vmov 1983009808  }
 0x114   :  { %v166_v21 = vunpack.c.l.s4 %v1646_v20 }
 0x115   :  { %v924_v41 = vmul.f32 %v922_v31, %v906_v30  ;;  %v925_v42 = vmul.f32 %v923_v35, %v907_v34  ;;  %v1803_v30 = vld [vmem:[%s2566_s5] sm:$0xf] }
 0x116   :  { %v167_v23 = vunpack.c.0.s8 %v166_v21 }
 0x167   :  { %v337_v32 = vpop.permute.xlu1 %336 }
 0x168   :  { %v358_v36 = vadd.f32 %v353_v25, %v337_v32  ;;  %v359_v37 = vadd.f32 %v357_v28, %v337_v32 }
 0x16a   :  { %v360_v38 = vsub.f32 %v358_v36, %v323_v29  ;;  %v361_v39 = vsub.f32 %v359_v37, %v324_v33 }
 0x16b   :  { %v938_v40 = vpop.permute.xlu0 %937 }
 0x16c   :  { %1537 = vrcp.f32 %v360_v38  ;;  %v940_v43 = vadd.f32 %v938_v40, %v353_v25  ;;  %v941_v44 = vadd.f32 %v938_v40, %v357_v28  ;;  %v1793_v25 = vsub.s32 %v167_v23, %v1722_v19  ;;  %v1798_v28 = vld [vmem:[%s2566_s5 + $0x4] sm:$0xf] }
 0x16d   :  { %1539 = vrcp.f32 %v361_v39 }
 0x16e   :  { %v942_v45 = vsub.f32 %v940_v43, %v924_v41  ;;  %v943_v46 = vsub.f32 %v941_v44, %v925_v42  ;;  %v1807_v31 = vrot.slane %v1798_v28, %v1793_v25  ;;  %v1811_v32 = vrot.slane %v1803_v30, %v1793_v25 }
 0x170   :  { %1541 = vrcp.f32 %v942_v45  ;;  %v199_v34 = vsel %vm175_vm8, %v1807_v31, -inf  ;;  %v176_v35 = vsel %vm175_vm8, %v1811_v32, -inf }
 0x171   :  { %1543 = vrcp.f32 %v943_v46 }
 0x179   :  { %v1538_v47 = vpop.eup %1537 }
 0x17a   :  { %v1540_v48 = vpop.eup %1539  ;;  %v1758_v49 = vmul.f32 %v1538_v47, %v323_v29  ;;  %v1815_v29 = vcombine.high %v1807_v31, %v1807_v31 }
 0x17b   :  { %v1760_v50 = vmul.f32 %v1540_v48, %v324_v33  ;;  %v1819_v33 = vcombine.high %v1811_v32, %v1811_v32 }
 0x17c   :  { %v200_v36 = vsel %vm175_vm8, %v1815_v29, -inf  ;;  %v366_v40 = vrot.slane %v1758_v49, 4 }
 0x17d   :  { %v1542_v51 = vpop.eup %1541  ;;  %v400_v52 = vmax.f32 %v1758_v49, %v1760_v50  ;;  %v177_v37 = vsel %vm175_vm8, %v1819_v33, -inf  ;;  %v201_v38 = vmax.f32 %v199_v34, %v200_v36 }
 0x17e   :  { %v1544_v53 = vpop.eup %1543  ;;  %v1764_v54 = vmul.f32 %v1542_v51, %v924_v41  ;;  %v178_v39 = vmax.f32 %v176_v35, %v177_v37  ;;  %v372_v41 = vrot.slane %v1760_v50, 4 }
 0x17f   :  { %v1766_v55 = vmul.f32 %v1544_v53, %v925_v42  ;;  %401 = vmax.xlane.f32.xlu1 %v400_v52  ;;  %v367_v42 = vmax.f32 %v1758_v49, %v366_v40 }
 0x180   :  { %v948_v43 = vrot.slane %v1764_v54, 4  ;;  %v373_v44 = vmax.f32 %v1760_v50, %v372_v41 }
 0x181   :  { %v982_v56 = vmax.f32 %v1764_v54, %v1766_v55  ;;  %v368_v45 = vrot.slane %v367_v42, 2  ;;  %v954_v47 = vrot.slane %v1766_v55, 4 }
 0x182   :  { %v374_v46 = vrot.slane %v373_v44, 2  ;;  %v949_v48 = vmax.f32 %v1764_v54, %v948_v43 }
 0x183   :  { %983 = vmax.xlane.f32.xlu0 %v982_v56  ;;  %v369_v51 = vmax.f32 %v367_v42, %v368_v45  ;;  %v955_v53 = vmax.f32 %v1766_v55, %v954_v47 }
 0x184   :  { %v375_v52 = vmax.f32 %v373_v44, %v374_v46  ;;  %v950_v56 = vrot.slane %v949_v48, 2 }
 0x208   :  { %v402_v59 = vpop.xlane.xlu1 %401 }
 0x209   :  { %vm403_vm0 = vcmp.eq.f32.partialorder %v1758_v49, %v402_v59  ;;  %vm404_vm1 = vcmp.eq.f32.partialorder %v1760_v50, %v402_v59  ;;  %v370_v59 = vrot.slane %v369_v51, 1 }
 0x20a   :  { %v405_v60 = vsel %vm403_vm0, %v1771_v57, 256  ;;  %v406_v61 = vsel %vm404_vm1, %v1774_v58, 256 }
 0x20b   :  { %vm407_vm2 = vcmp.lt.s32.totalorder %v405_v60, %v406_v61 }
 0x20c   :  { %v984_v62 = vpop.xlane.xlu0 %983  ;;  %v408_v63 = vsel %vm407_vm2, %v405_v60, %v406_v61  ;;  %v376_v60 = vrot.slane %v375_v52, 1  ;;  %v956_v61 = vrot.slane %v955_v53, 2 }
 0x20d   :  { %vm985_vm3 = vcmp.eq.f32.partialorder %v1764_v54, %v984_v62  ;;  %vm986_vm4 = vcmp.eq.f32.partialorder %v1766_v55, %v984_v62  ;;  %v410_v0 = vshra.s32 %v408_v63, 16  ;;  %v409_v8 = vand.u32 65535, %v408_v63 }
 0x20e   :  { %v987_v2 = vsel %vm985_vm3, %v1771_v57, 256  ;;  %v988_v3 = vsel %vm986_vm4, %v1774_v58, 256  ;;  %v951_v62 = vmax.f32 %v949_v48, %v950_v56  ;;  %v1837_v63 = vmax.f32 %v369_v51, %v370_v59  ;;  %v1493_v56 = vld [vmem:[%s2562_s1 + $0x18] sm:$0xff] }
 0x20f   :  { %vm989_vm5 = vcmp.lt.s32.totalorder %v987_v2, %v988_v3  ;;  %v412_v4 = vcvt.s32.f32 %v410_v0  ;;  %v411_v10 = vcvt.s32.f32 %v409_v8  ;;  %v1839_v0 = vmax.f32 %v375_v52, %v376_v60 }
 0x210   :  { %v990_v5 = vsel %vm989_vm5, %v987_v2, %v988_v3  ;;  %v957_v2 = vmax.f32 %v955_v53, %v956_v61  ;;  %v952_v3 = vrot.slane %v951_v62, 1  ;;  %vm378_vm9 = vcmp.eq.f32.partialorder %v1758_v49, %v1837_v63 }
 0x211   :  { %413 = vmin.xlane.f32.xlu1 %v412_v4  ;;  %v992_v6 = vshra.s32 %v990_v5, 16  ;;  %v991_v11 = vand.u32 65535, %v990_v5  ;;  %vm379_vm10 = vcmp.eq.f32.partialorder %v1760_v50, %v1839_v0 }
 0x212   :  { %v958_v5 = vrot.slane %v957_v2, 1 }
 0x213   :  { %v994_v7 = vcvt.s32.f32 %v992_v6  ;;  %v993_v15 = vcvt.s32.f32 %v991_v11  ;;  %v1846_v6 = vmax.f32 %v951_v62, %v952_v3 }
 0x215   :  { %995 = vmin.xlane.f32.xlu0 %v994_v7  ;;  %vm960_vm11 = vcmp.eq.f32.partialorder %v1764_v54, %v1846_v6 }
 0x216   :  { %v962_v49 = vsel %vm960_vm11, %v1722_v19, 8 }
 0x29a   :  { %v1784_v9 = vpop.xlane.xlu1 %413 }
 0x29b   :  { %vm415_vm6 = vcmp.eq.f32.partialorder %v412_v4, %v1784_v9  ;;  %v380_v4 = vsel %vm378_vm9, %v1722_v19, 8  ;;  %v420_v34 = vcvt.f32.s32 %v1784_v9 }
 0x29c   :  { %v416_v12 = vsel %vm415_vm6, %v411_v10, inf  ;;  %v382_v8 = vrot.slane %v380_v4, 4  ;;  %v1849_v10 = vmax.f32 %v957_v2, %v958_v5 }
 0x29d   :  { %417 = vmin.xlane.f32.xlu1 %v416_v12  ;;  %v964_v12 = vrot.slane %v962_v49, 4 }
 0x29e   :  { %v1787_v13 = vpop.xlane.xlu0 %995  ;;  %vm383_vm12 = vcmp.lt.s32.totalorder %v380_v4, %v382_v8  ;;  %vm961_vm13 = vcmp.eq.f32.partialorder %v1766_v55, %v1849_v10  ;;  %v421_v55 = vshll.u32 %v420_v34, 16 }
 0x29f   :  { %vm997_vm7 = vcmp.eq.f32.partialorder %v994_v7, %v1787_v13  ;;  %v381_v7 = vsel %vm379_vm10, %v1722_v19, 8  ;;  %v384_v50 = vsel %vm383_vm12, %v380_v4, %v382_v8  ;;  %vm965_vm15 = vcmp.lt.s32.totalorder %v962_v49, %v964_v12 }
 0x2a0   :  { %v998_v16 = vsel %vm997_vm7, %v993_v15, inf  ;;  %v391_v11 = vrot.slane %v381_v7, 4  ;;  %v963_v15 = vsel %vm961_vm13, %v1722_v19, 8  ;;  %v385_v20 = vrot.slane %v384_v50, 2 }
 0x2a1   :  { %999 = vmin.xlane.f32.xlu0 %v998_v16  ;;  %179 = vmax.xlane.f32.xlu1 %v178_v39  ;;  %v973_v21 = vrot.slane %v963_v15, 4  ;;  %v966_v54 = vsel %vm965_vm15, %v962_v49, %v964_v12 }
 0x2a2   :  { %vm392_vm14 = vcmp.lt.s32.totalorder %v381_v7, %v391_v11  ;;  %vm386_vm0 = vcmp.lt.s32.totalorder %v384_v50, %v385_v20  ;;  %v967_v37 = vrot.slane %v966_v54, 2 }
 0x2a3   :  { %v393_v16 = vsel %vm392_vm14, %v381_v7, %v391_v11  ;;  %vm974_vm1 = vcmp.lt.s32.totalorder %v963_v15, %v973_v21  ;;  %v387_v36 = vsel %vm386_vm0, %v384_v50, %v385_v20 }
 0x2a4   :  { %v394_v23 = vrot.slane %v393_v16, 2  ;;  %v975_v40 = vsel %vm974_vm1, %v963_v15, %v973_v21  ;;  %v388_v44 = vrot.slane %v387_v36, 1  ;;  %vm968_vm3 = vcmp.lt.s32.totalorder %v966_v54, %v967_v37 }
 0x2a5   :  { %202 = vmax.xlane.f32.xlu0 %v201_v38  ;;  %v1002_v38 = vcvt.f32.s32 %v1787_v13  ;;  %v976_v45 = vrot.slane %v975_v40, 2  ;;  %v969_v60 = vsel %vm968_vm3, %v966_v54, %v967_v37 }
 0x2a6   :  { %vm395_vm2 = vcmp.lt.s32.totalorder %v393_v16, %v394_v23  ;;  %vm1863_vm6 = vcmp.lt.s32.totalorder %v387_v36, %v388_v44 }
 0x2a7   :  { %v396_v43 = vsel %vm395_vm2, %v393_v16, %v394_v23  ;;  %v1003_v46 = vshll.u32 %v1002_v38, 16  ;;  %vm1867_vm7 = vcmp.lt.s32.totalorder %v975_v40, %v976_v45  ;;  %v390_v49 = vsel %vm1863_vm6, %v387_v36, %v388_v44  ;;  %v457_v44 = vld [vmem:[%s2562_s1] sm:$0xff] }
 0x2a8   :  { %v397_v53 = vrot.slane %v396_v43, 1 }
 0x2aa   :  { %vm1875_vm13 = vcmp.lt.s32.totalorder %v396_v43, %v397_v53 }
 0x2ab   :  { %v399_v54 = vsel %vm1875_vm13, %v396_v43, %v397_v53  ;;  %v1492_v53 = vld [vmem:[%s2562_s1 + $0x10] sm:$0xff] }
 0x326   :  { %v418_v35 = vpop.xlane.xlu1 %417 }
 0x327   :  { %v419_v39 = vcvt.f32.s32 %v418_v35 }
 0x329   :  { %v422_v41 = vadd.s32 %v421_v55, %v419_v39 }
 0x32a   :  { %v1000_v42 = vpop.xlane.xlu0 %999 }
 0x32b   :  { %vm423_vm4 = vcmp.eq.s32.totalorder %v1771_v57, %v422_v41  ;;  %vm424_vm5 = vcmp.eq.s32.totalorder %v1774_v58, %v422_v41  ;;  %v1001_v9 = vcvt.f32.s32 %v1000_v42 }
 0x32c   :  { %v425_v47 = vsel %vm423_vm4, %v1722_v19, 4294967295  ;;  %v426_v48 = vsel %vm424_vm5, %v1722_v19, 4294967295 }
 0x32d   :  { %v427_v51 = vrot.slane %v425_v47, 4  ;;  %v436_v13 = vrot.slane %v426_v48, 4  ;;  %v1004_v52 = vadd.s32 %v1003_v46, %v1001_v9 }
 0x32e   :  { %v203_v59 = vpop.xlane.xlu0 %202 }
 0x32f   :  { %vm428_vm9 = vcmp.gt.s32.totalorder %v425_v47, %v427_v51  ;;  %vm437_vm10 = vcmp.gt.s32.totalorder %v426_v48, %v436_v13  ;;  %vm1005_vm11 = vcmp.eq.s32.totalorder %v1771_v57, %v1004_v52  ;;  %vm1006_vm12 = vcmp.eq.s32.totalorder %v1774_v58, %v1004_v52  ;;  %v458_v52 = vld [vmem:[%s2562_s1 + $0x8] sm:$0xff] }
 0x330   :  { %v429_v61 = vsel %vm428_vm9, %v425_v47, %v427_v51  ;;  %v438_v62 = vsel %vm437_vm10, %v426_v48, %v436_v13  ;;  %v1007_v2 = vsel %vm1005_vm11, %v1722_v19, 4294967295  ;;  %v1008_v3 = vsel %vm1006_vm12, %v1722_v19, 4294967295 }
 0x331   :  { %v430_v4 = vrot.slane %v429_v61, 2  ;;  %v439_v5 = vrot.slane %v438_v62, 2  ;;  %v1009_v7 = vrot.slane %v1007_v2, 4  ;;  %v1018_v8 = vrot.slane %v1008_v3, 4 }
 0x332   :  { %v978_v57 = vsel %vm1867_vm7, %v975_v40, %v976_v45  ;;  %v970_v58 = vrot.slane %v969_v60, 1  ;;  %vm459_vm10 = vcmask 64512   ;;  %v1647_v45 = vmov 1.0  }
 0x333   :  { %vm1010_vm14 = vcmp.gt.s32.totalorder %v1007_v2, %v1009_v7  ;;  %vm1019_vm15 = vcmp.gt.s32.totalorder %v1008_v3, %v1018_v8  ;;  %vm440_vm0 = vcmp.gt.s32.totalorder %v438_v62, %v439_v5  ;;  %vm431_vm1 = vcmp.gt.s32.totalorder %v429_v61, %v430_v4 }
 0x334   :  { %v1011_v50 = vsel %vm1010_vm14, %v1007_v2, %v1009_v7  ;;  %v1020_v12 = vsel %vm1019_vm15, %v1008_v3, %v1018_v8  ;;  %v441_v15 = vsel %vm440_vm0, %v438_v62, %v439_v5  ;;  %v432_v16 = vsel %vm431_vm1, %v429_v61, %v430_v4 }
 0x335   :  { %v1012_v20 = vrot.slane %v1011_v50, 2  ;;  %v1021_v21 = vrot.slane %v1020_v12, 2  ;;  %v442_v23 = vrot.slane %v441_v15, 1  ;;  %v433_v34 = vrot.slane %v432_v16, 1 }
 0x336   :  { %v979_v35 = vrot.slane %v978_v57, 1  ;;  %vm1885_vm2 = vcmp.lt.s32.totalorder %v969_v60, %v970_v58  ;;  %v204_v61 = vsel %vm175_vm8, %v203_v59, -inf }
 0x337   :  { %vm443_vm3 = vcmp.gt.s32.totalorder %v441_v15, %v442_v23  ;;  %vm434_vm4 = vcmp.gt.s32.totalorder %v432_v16, %v433_v34  ;;  %vm1022_vm5 = vcmp.gt.s32.totalorder %v1020_v12, %v1021_v21  ;;  %vm1013_vm6 = vcmp.gt.s32.totalorder %v1011_v50, %v1012_v20 }
 0x338   :  { %v1889_v37 = vsel %vm443_vm3, %v441_v15, %v442_v23  ;;  %v1891_v55 = vsel %vm434_vm4, %v432_v16, %v433_v34  ;;  %v1023_v38 = vsel %vm1022_vm5, %v1020_v12, %v1021_v21  ;;  %v1014_v39 = vsel %vm1013_vm6, %v1011_v50, %v1012_v20 }
 0x339   :  { %vm446_vm7 = vcmp.ge.s32.totalorder %v1889_v37, 0  ;;  %vm445_vm9 = vcmp.ge.s32.totalorder %v1891_v55, 0  ;;  %v1024_v40 = vrot.slane %v1023_v38, 1  ;;  %v1015_v41 = vrot.slane %v1014_v39, 1 }
 0x33a   :  { %v450_v42 = vsel %vm446_vm7, %v1889_v37, %v399_v54  ;;  %v449_v43 = vsel %vm445_vm9, %v1891_v55, %v390_v49  ;;  %vm980_vm11 = vcmp.lt.s32.totalorder %v978_v57, %v979_v35  ;;  %v972_v48 = vsel %vm1885_vm2, %v969_v60, %v970_v58  ;;  %v180_v60 = vpop.xlane.xlu1 %179 }
 0x33b   :  { %vm452_vm12 = vcmp.eq.s32.totalorder %v450_v42, %v1722_v19  ;;  %vm451_vm13 = vcmp.eq.s32.totalorder %v449_v43, %v1722_v19  ;;  %vm1025_vm14 = vcmp.gt.s32.totalorder %v1023_v38, %v1024_v40  ;;  %vm1016_vm15 = vcmp.gt.s32.totalorder %v1014_v39, %v1015_v41 }
 0x33c   :  { %1476 = vmatprep.subr.msk.mxu0 %vm452_vm12, %v1647_v45  ;;  %v1906_v46 = vsel %vm1025_vm14, %v1023_v38, %v1024_v40  ;;  %v1908_v9 = vsel %vm1016_vm15, %v1014_v39, %v1015_v41  ;;  %v981_v47 = vsel %vm980_vm11, %v978_v57, %v979_v35  ;;  %v181_v62 = vsel %vm175_vm8, %v180_v60, -inf }
 0x33d   :  { %1477 = vmatpush1.msk.msra.mxu0 %vm451_vm13, %v1647_v45  ;;  %vm1028_vm0 = vcmp.ge.s32.totalorder %v1906_v46, 0  ;;  %vm1027_vm1 = vcmp.ge.s32.totalorder %v1908_v9, 0  ;;  %v205_v2 = vrot.slane %v204_v61, 4  ;;  %v182_v3 = vrot.slane %v181_v62, 4 }
 0x33e   :  { %1478 = vmatmul.mubr.msk.f32.vlgmr.msra.gmra.mxu0 %vm459_vm10, %v457_v44  ;;  %v1032_v51 = vsel %vm1028_vm0, %v1906_v46, %v981_v47  ;;  %v1031_v13 = vsel %vm1027_vm1, %v1908_v9, %v972_v48  ;;  %vm2577_vm6 = vcmask 1043456   ;;  %v2051_v37 = vsel %vm1028_vm0, 2.0, %v1849_v10 }
 0x33f   :  { %vm1034_vm3 = vcmp.eq.s32.totalorder %v1032_v51, %v1722_v19  ;;  %536 = vmatprep.mubr.f32.mxu0 %v2574_v18  ;;  %vm1033_vm4 = vcmp.eq.s32.totalorder %v1031_v13, %v1722_v19  ;;  %v206_v4 = vmax.f32 %v204_v61, %v205_v2  ;;  %v183_v5 = vmax.f32 %v181_v62, %v182_v3 }
 0x340   :  { %1494 = vmatprep.subr.msk.mxu1 %vm1034_vm3, %v1647_v45  ;;  %vm2217_vm3 = vcmp.lt.s32.totalorder %v46_v17, 256 }
 0x341   :  { %1495 = vmatpush1.msk.msra.mxu1 %vm1033_vm4, %v1647_v45  ;;  %v207_v7 = vrot.slane %v206_v4, 2  ;;  %v184_v8 = vrot.slane %v183_v5, 2  ;;  %vm1126_vm4 = vcmp.lt.f32.partialorder %v2051_v37, 0.35  ;;  %v1502_v37 = vld [vmem:[%s2565_s4 + $0x20] sm:$0xff] }
 0x342   :  { %1479 = vmatmul.mubr.msk.f32.gmra.mxu0 %vm459_vm10, %v458_v52  ;;  %1496 = vmatmul.mubr.msk.f32.vlgmr.msra.gmra.mxu1 %vm459_vm10, %v1492_v53 }
 0x343   :  { %1118 = vmatprep.mubr.f32.mxu1 %v2574_v18  ;;  %v208_v11 = vmax.f32 %v206_v4, %v207_v7  ;;  %v185_v49 = vmax.f32 %v183_v5, %v184_v8 }
 0x345   :  { %v209_v57 = vrot.slane %v208_v11, 1  ;;  %v186_v58 = vrot.slane %v185_v49, 1 }
 0x346   :  { %1497 = vmatmul.mubr.msk.f32.gmra.mxu1 %vm459_vm10, %v1493_v56 }
 0x347   :  { %v210_v50 = vmax.f32 %v208_v11, %v209_v57  ;;  %v187_v12 = vmax.f32 %v185_v49, %v186_v58  ;;  %v48_v11 = vadd.s32 8, %v1722_v19  ;;  %v123_v57 = vsub.s32 2, %v1722_v19 }
 0x348   :  { %v141_v58 = vsub.s32 3, %v1722_v19 }
 0x349   :  { %v1939_v15 = vmax.f32 %v187_v12, %v210_v50  ;;  %v1959_v12 = vsub.s32 6, %v1722_v19 }
 0x34b   :  { %v787_v16 = vsub.f32 %v1803_v30, %v1939_v15  ;;  %v1318_v20 = vsub.f32 %v1798_v28, %v1939_v15 }
 0x34d   :  { %v788_v21 = vmul.f32 1.442695, %v787_v16  ;;  %v1319_v23 = vmul.f32 1.442695, %v1318_v20  ;;  %v145_v16 = vsub.s32 7, %v1722_v19 }
 0x34f   :  { %1545 = vpow2.f32 %v788_v21  ;;  %v1964_v21 = vrot.slane %v1718_v14, %v1736_v27  ;;  %v1981_v27 = vrot.slane %v1718_v14, %v1729_v24 }
 0x350   :  { %1547 = vpow2.f32 %v1319_v23 }
 0x351   :  { %1549 = vrcp.f32 %v1718_v14 }
 0x35c   :  { %v1546_v34 = vpop.eup %1545 }
 0x35d   :  { %v1548_v54 = vpop.eup %1547  ;;  %v797_v35 = vrot.slane %v1546_v34, %v1793_v25  ;;  %v1968_v34 = vrot.slane %v1718_v14, %v1725_v22 }
 0x35e   :  { %v1328_v36 = vrot.slane %v1548_v54, %v1793_v25  ;;  %v1952_v4 = vpop.eup %1549  ;;  %v1972_v54 = vrot.slane %v1718_v14, %v1733_v26 }
 0x35f   :  { %v798_v38 = vcombine.high %v797_v35, %v797_v35  ;;  %v801_v39 = vsel %vm175_vm8, %v797_v35, 0.0  ;;  %v45_v49 = vmul.f32 10.0, %v1952_v4  ;;  %v53_v35 = vand.u32 1, %v1722_v19 }
 0x360   :  { %v1329_v40 = vcombine.high %v1328_v36, %v1328_v36  ;;  %v802_v30 = vrot.slane %v801_v39, 4  ;;  %v1332_v42 = vsel %vm175_vm8, %v1328_v36, 0.0  ;;  %v60_v36 = vand.u32 1, %v48_v11 }
 0x361   :  { %v808_v41 = vsel %vm175_vm8, %v798_v38, 0.0  ;;  %v1333_v44 = vrot.slane %v1332_v42, 4  ;;  %v1975_v38 = vrot.slane %v45_v49, %v123_v57  ;;  %vm1988_vm2 = vcmp.eq.s32.totalorder %v53_v35, 0 }
 0x362   :  { %v1339_v28 = vsel %vm175_vm8, %v1329_v40, 0.0  ;;  %v809_v43 = vrot.slane %v808_v41, 4  ;;  %v803_v45 = vadd.f32 %v802_v30, %v801_v39  ;;  %v1977_v39 = vrot.slane %v45_v49, %v141_v58 }
 0x363   :  { %v1340_v47 = vrot.slane %v1339_v28, 4  ;;  %v1334_v51 = vadd.f32 %v1333_v44, %v1332_v42  ;;  %v1984_v40 = vrot.slane %v45_v49, %v1959_v12  ;;  %vm1992_vm5 = vcmp.eq.s32.totalorder %v60_v36, 0 }
 0x364   :  { %v810_v48 = vadd.f32 %v809_v43, %v808_v41  ;;  %v804_v25 = vrot.slane %v803_v45, 2  ;;  %v1986_v41 = vrot.slane %v45_v49, %v145_v16  ;;  %v93_v14 = vrot.slane %v1968_v34, %v1725_v22 }
 0x365   :  { %v1341_v13 = vadd.f32 %v1340_v47, %v1339_v28  ;;  %v1335_v53 = vrot.slane %v1334_v51, 2  ;;  %v111_v24 = vrot.slane %v1972_v54, %v1733_v26  ;;  %v134_v28 = vrot.slane %v1975_v38, %v123_v57 }
 0x366   :  { %v811_v52 = vrot.slane %v810_v48, 2  ;;  %v805_v56 = vadd.f32 %v804_v25, %v803_v45  ;;  %v152_v43 = vrot.slane %v1977_v39, %v141_v58  ;;  %v97_v44 = vrot.slane %v1981_v27, %v1725_v22 }
 0x367   :  { %v1342_v59 = vrot.slane %v1341_v13, 2  ;;  %v1336_v61 = vadd.f32 %v1335_v53, %v1334_v51  ;;  %v115_v45 = vrot.slane %v1964_v21, %v1733_v26  ;;  %v138_v47 = vrot.slane %v1984_v40, %v123_v57 }
 0x368   :  { %v812_v60 = vadd.f32 %v811_v52, %v810_v48  ;;  %v806_v62 = vrot.slane %v805_v56, 1  ;;  %v156_v48 = vrot.slane %v1986_v41, %v141_v58  ;;  %v116_v51 = vsel %vm1988_vm2, %v93_v14, %v111_v24 }
 0x369   :  { %v1343_v2 = vadd.f32 %v1342_v59, %v1341_v13  ;;  %v1337_v5 = vrot.slane %v1336_v61, 1  ;;  %v118_v25 = vsel %vm1992_vm5, %v93_v14, %v111_v24  ;;  %v157_v13 = vsel %vm1988_vm2, %v134_v28, %v152_v43 }
 0x36a   :  { %v813_v3 = vrot.slane %v812_v60, 1  ;;  %v807_v7 = vadd.f32 %v806_v62, %v805_v56  ;;  %v159_v52 = vsel %vm1992_vm5, %v134_v28, %v152_v43  ;;  %v117_v22 = vsel %vm1988_vm2, %v97_v44, %v115_v45 }
 0x36b   :  { %v1344_v8 = vrot.slane %v1343_v2, 1  ;;  %v1338_v20 = vadd.f32 %v1337_v5, %v1336_v61  ;;  %v1648_v26 = vmov 1966171168   ;;  %v119_v56 = vsel %vm1992_vm5, %v97_v44, %v115_v45 }
 0x36c   :  { %v814_v50 = vadd.f32 %v813_v3, %v812_v60  ;;  %1551 = vlog2.f32 %v807_v7  ;;  %v847_v53 = vunpack.c.l.s4 %v1648_v26  ;;  %v158_v59 = vsel %vm1988_vm2, %v138_v47, %v156_v48 }
 0x36d   :  { %v1345_v23 = vadd.f32 %v1344_v8, %v1343_v2  ;;  %v160_v60 = vsel %vm1992_vm5, %v138_v47, %v156_v48  ;;  %v447_v61 = vsel %vm445_vm9, 2.0, %v1837_v63  ;;  %v2027_v62 = vrot.slane %v116_v51, 4 }
 0x36e   :  { %1553 = vlog2.f32 %v814_v50  ;;  %v680_v2 = vrot.slane %v118_v25, 4  ;;  %v2032_v3 = vsel %vm446_vm7, 2.0, %v1839_v0  ;;  %v2034_v7 = vrot.slane %v157_v13, 4 }
 0x36f   :  { %1555 = vlog2.f32 %v1338_v20  ;;  %v698_v8 = vrot.slane %v159_v52, 4  ;;  %v2036_v11 = vrot.slane %v117_v22, 4  ;;  %v682_v49 = vrot.slane %v119_v56, 4 }
 0x370   :  { %1557 = vlog2.f32 %v1345_v23  ;;  %v2038_v50 = vrot.slane %v158_v59, 4  ;;  %v700_v55 = vrot.slane %v160_v60, 4  ;;  %v848_v63 = vunpack.c.0.s8 %v847_v53 }
 0x371   :  { %v2041_v23 = vrot.slane %v1952_v4, %v123_v57  ;;  %vm543_vm9 = vcmp.lt.f32.partialorder %v447_v61, 0.35  ;;  %v2046_v0 = vsel %vm1027_vm1, 2.0, %v1846_v6  ;;  %v2054_v30 = vrot.slane %v1952_v4, %v141_v58 }
 0x372   :  { %v2058_v57 = vrot.slane %v1952_v4, %v1959_v12  ;;  %v2061_v42 = vrot.slane %v1952_v4, %v145_v16  ;;  %v2065_v10 = vsel %vm2577_vm6, %v2027_v62, %v680_v2  ;;  %v2069_v46 = vsel %vm2577_vm6, %v2034_v7, %v698_v8 }
 0x373   :  { %v2076_v4 = vsel %vm2577_vm6, %v2036_v11, %v682_v49  ;;  %v2080_v16 = vsel %vm2577_vm6, %v2038_v50, %v700_v55  ;;  %v2083_v43 = vsub.s32 %v848_v63, %v1722_v19  ;;  %vm623_vm7 = vcmask 1040384  }
 0x374   :  { %vm544_vm10 = vcmp.lt.f32.partialorder %v2032_v3, 0.35  ;;  %vm1125_vm0 = vcmp.lt.f32.partialorder %v2046_v0, 0.35 }
 0x379   :  { %v1552_v5 = vpop.eup %1551 }
 0x37a   :  { %v816_v9 = vmul.f32 0.6931472, %v1552_v5 }
 0x37b   :  { %v1554_v20 = vpop.eup %1553 }
 0x37c   :  { %v1556_v35 = vpop.eup %1555  ;;  %v2088_v25 = vadd.f32 %v816_v9, %v1939_v15  ;;  %v818_v13 = vmul.f32 0.6931472, %v1554_v20 }
 0x37d   :  { %v1558_v6 = vpop.eup %1557  ;;  %v1347_v52 = vmul.f32 0.6931472, %v1556_v35 }
 0x37e   :  { %v1349_v22 = vmul.f32 0.6931472, %v1558_v6 }
 0x3fe   :  { %v532_v36 = vpop.f32.mrf.mxu0 }
 0x3ff   :  { %v564_v14 = vrot.slane %v532_v36, 2  ;;  %v580_v24 = vrot.slane %v532_v36, 6  ;;  %v688_v28 = vsub.f32 %v532_v36, %v2027_v62 }
 0x400   :  { %v2071_v58 = vpop.f32.mrf.mxu0 }
 0x401   :  { %v568_v44 = vadd.f32 %v564_v14, %v532_v36  ;;  %v584_v45 = vsub.f32 %v532_v36, %v580_v24  ;;  %v565_v47 = vrot.slane %v2071_v58, 2  ;;  %v581_v48 = vrot.slane %v2071_v58, 6 }
 0x402   :  { %v538_v51 = vpop.f32.mrf.mxu0  ;;  %v706_v8 = vmul.f32 %v2034_v7, %v688_v28  ;;  %v1114_v28 = vpop.f32.mrf.mxu1 }
 0x403   :  { %v570_v26 = vmul.f32 0.5, %v568_v44  ;;  %v597_v53 = vmul.f32 %v2041_v23, %v584_v45  ;;  %v615_v56 = vmul.f32 %v2054_v30, %v584_v45  ;;  %v569_v59 = vadd.f32 %v565_v47, %v2071_v58 }
 0x404   :  { %v585_v60 = vsub.f32 %v2071_v58, %v581_v48  ;;  %v2095_v2 = vsel %vm543_vm9, 0.0, %v538_v51  ;;  %v690_v5 = vsub.f32 %v538_v51, %v2065_v10  ;;  %v2117_v47 = vadd.f32 %v818_v13, %v1939_v15 }
 0x405   :  { %v572_v49 = vsub.f32 %v570_v26, %v1968_v34  ;;  %v576_v55 = vsub.f32 %v570_v26, %v1972_v54  ;;  %1559 = vlog2.f32 %v597_v53  ;;  %v571_v63 = vmul.f32 0.5, %v569_v59 }
 0x406   :  { %1561 = vlog2.f32 %v615_v56  ;;  %v598_v20 = vmul.f32 %v2058_v57, %v585_v60  ;;  %v616_v35 = vmul.f32 %v2061_v42, %v585_v60  ;;  %vm547_vm11 = vcmp.ne.f32.partialorder %v2095_v2, 0.0 }
 0x407   :  { %v574_v61 = vmul.f32 %v572_v49, %v1975_v38  ;;  %v578_v36 = vmul.f32 %v576_v55, %v1977_v39  ;;  %v573_v9 = vsub.f32 %v571_v63, %v1981_v27  ;;  %v577_v6 = vsub.f32 %v571_v63, %v1964_v21 }
 0x408   :  { %1563 = vlog2.f32 %v598_v20  ;;  %vm549_vm12 = vcmp.gt.f32.partialorder %v2095_v2, 0.0  ;;  %v643_v14 = vsel %vm547_vm11, 1, %v2572_v1  ;;  %v708_v24 = vmul.f32 %v2069_v46, %v690_v5  ;;  %v540_v5 = vpop.f32.mrf.mxu0 }
 0x409   :  { %v575_v44 = vmul.f32 %v573_v9, %v1984_v40  ;;  %v579_v45 = vmul.f32 %v577_v6, %v1986_v41  ;;  %1565 = vlog2.f32 %v616_v35  ;;  %v2120_v48 = vrot.slane %v643_v14, %v1959_v12 }
 0x40a   :  { %v689_v51 = vsub.f32 %v2071_v58, %v2036_v11  ;;  %v2125_v26 = vadd.f32 %v1347_v52, %v1939_v15  ;;  %v2128_v53 = vadd.f32 %v1349_v22, %v1939_v15  ;;  %v2133_v56 = vsel %vm549_vm12, 1, %v2572_v1  ;;  %v712_v52 = vld [vmem:[%s2565_s4 + $0x10] sm:$0x3] }
 0x40b   :  { %v718_v59 = vrot.slane %v706_v8, 4  ;;  %v1145_v13 = vrot.slane %v1114_v28, 2  ;;  %v1161_v60 = vrot.slane %v1114_v28, 6  ;;  %v2136_v49 = vsel %vm623_vm7, %v574_v61, %v578_v36 }
 0x40c   :  { %v719_v55 = vrot.slane %v708_v24, 4  ;;  %vm821_vm13 = vcmp.eq.s32.totalorder %v1722_v19, %v2120_v48  ;;  %v2143_v15 = vsel %vm547_vm11, 1.0, %v2574_v18  ;;  %v2146_v58 = vsel %vm623_vm7, %v575_v44, %v579_v45 }
 0x40d   :  { %v823_v22 = vsel %vm821_vm13, %v1811_v32, 0.0  ;;  %v1149_v8 = vadd.f32 %v1145_v13, %v1114_v28  ;;  %v1165_v63 = vsub.f32 %v1114_v28, %v1161_v60  ;;  %v1232_v61 = vsub.f32 %v1114_v28, %v2027_v62  ;;  %v710_v32 = vld [vmem:[%s2565_s4] sm:$0xff] }
 0x40e   :  { %v825_v35 = vsel %vm175_vm8, %v823_v22, 0.0  ;;  %v2158_v36 = vsel %vm544_vm10, 0.0, %v540_v5  ;;  %v720_v44 = vsel %vm2577_vm6, %v718_v59, %v719_v55  ;;  %v2166_v45 = vsub.f32 %v712_v52, %v719_v55 }
 0x40f   :  { %v826_v9 = vrot.slane %v825_v35, 4  ;;  %v1151_v6 = vmul.f32 0.5, %v1149_v8  ;;  %v1167_v14 = vmul.f32 %v1165_v63, %v2041_v23  ;;  %v1175_v24 = vmul.f32 %v1165_v63, %v2054_v30 }
 0x410   :  { %vm548_vm14 = vcmp.ne.f32.partialorder %v2158_v36, 0.0  ;;  %v691_v62 = vsub.f32 %v540_v5, %v2076_v4  ;;  %v2173_v30 = vmul.f32 %v1232_v61, %v2034_v7  ;;  %vm550_vm15 = vcmp.gt.f32.partialorder %v2158_v36, 0.0 }
 0x411   :  { %v827_v3 = vadd.f32 %v826_v9, %v825_v35  ;;  %v1153_v28 = vsub.f32 %v1151_v6, %v1968_v34  ;;  %v1157_v13 = vsub.f32 %v1151_v6, %v1972_v54  ;;  %1567 = vlog2.f32 %v1167_v14 }
 0x412   :  { %v1560_v23 = vpop.eup %1559  ;;  %1569 = vlog2.f32 %v1175_v24  ;;  %v644_v59 = vsel %vm548_vm14, 1, %v2572_v1  ;;  %v2179_v5 = vsub.f32 %v710_v32, %v720_v44  ;;  %v707_v7 = vmul.f32 %v2038_v50, %v689_v51  ;;  %v1116_v32 = vpop.f32.mrf.mxu1 }
 0x413   :  { %v1562_v60 = vpop.eup %1561  ;;  %v600_v55 = vmul.f32 0.6931472, %v1560_v23  ;;  %v828_v52 = vrot.slane %v827_v3, 2  ;;  %v1155_v34 = vmul.f32 %v1153_v28, %v1975_v38  ;;  %v1159_v54 = vmul.f32 %v1157_v13, %v1977_v39  ;;  %v713_v23 = vld [vmem:[%s2565_s4 + $0x18] sm:$0x3] }
 0x414   :  { %v2184_v22 = vrot.slane %v644_v59, %v1959_v12  ;;  %v709_v8 = vmul.f32 %v2080_v16, %v691_v62  ;;  %v618_v35 = vmul.f32 0.6931472, %v1562_v60  ;;  %v2190_v61 = vmul.f32 0.5, %v2166_v45  ;;  %v1120_v20 = vpop.f32.mrf.mxu1 }
 0x415   :  { %v1564_v63 = vpop.eup %1563  ;;  %v829_v9 = vadd.f32 %v828_v52, %v827_v3  ;;  %v2195_v38 = vsel %vm550_vm15, 1, %v2572_v1  ;;  %v2201_v51 = vsel %vm550_vm15, 1.0, %v2574_v18  ;;  %v2203_v44 = vmul.f32 5.0, %v600_v55 }
 0x416   :  { %2590 = vst [vmem:[#allocation9_spill] sm:$0xff] %v2184_v22  ;;  %v1566_v39 = vpop.eup %1565  ;;  %v602_v6 = vmul.f32 0.6931472, %v1564_v63  ;;  %v722_v24 = vrot.slane %v709_v8, 4  ;;  %v721_v3 = vrot.slane %v707_v7, 4  ;;  %vm822_vm1 = vcmp.eq.s32.totalorder %v1722_v19, %v2184_v22 }
 0x417   :  { %v830_v62 = vrot.slane %v829_v9, 1  ;;  %v620_v28 = vmul.f32 0.6931472, %v1566_v39  ;;  %v2208_v13 = vsel %vm623_vm7, %v1155_v34, %v1159_v54  ;;  %v824_v60 = vsel %vm822_vm1, %v1819_v33, 0.0  ;;  %v711_v34 = vld [vmem:[%s2565_s4 + $0x8] sm:$0xff] }
 0x418   :  { %v2221_v52 = vmul.f32 5.0, %v618_v35  ;;  %v723_v54 = vsel %vm2577_vm6, %v721_v3, %v722_v24  ;;  %v832_v8 = vsel %vm175_vm8, %v824_v60, 0.0  ;;  %v2228_v63 = vmul.f32 5.0, %v602_v6 }
 0x419   :  { %v831_v7 = vadd.f32 %v830_v62, %v829_v9  ;;  %v833_v39 = vrot.slane %v832_v8, 4  ;;  %v1488_v17 = vsel %vm548_vm14, 1.0, %v2574_v18  ;;  %v1146_v33 = vrot.slane %v1116_v32, 2 }
 0x41a   :  { %v2233_v35 = vsub.f32 %v713_v23, %v722_v24  ;;  %v871_v9 = vcombine.high %v2143_v15, %v1488_v17  ;;  %v1162_v62 = vrot.slane %v1116_v32, 6  ;;  %v1233_v59 = vsub.f32 %v1116_v32, %v2036_v11 }
 0x41b   :  { %v2237_v14 = vmul.f32 5.0, %v620_v28  ;;  %v2239_v3 = vsub.f32 %v711_v34, %v723_v54  ;;  %v834_v6 = vadd.f32 %v833_v39, %v832_v8  ;;  %v1150_v60 = vadd.f32 %v1146_v33, %v1116_v32 }
 0x41c   :  { %v839_v1 = vsub.f32 %v2088_v25, %v831_v7  ;;  %v878_v18 = vrot.slane %v871_v9, %v2083_v43  ;;  %v1166_v22 = vsub.f32 %v1116_v32, %v1162_v62  ;;  %v2246_v24 = vsel %vm1125_vm0, 0.0, %v1120_v20 }
 0x41d   :  { %v835_v23 = vrot.slane %v834_v6, 2  ;;  %v1152_v11 = vmul.f32 0.5, %v1150_v60  ;;  %v2249_v28 = vmul.f32 %v1233_v59, %v2038_v50  ;;  %v1234_v34 = vsub.f32 %v1120_v20, %v2065_v10  ;;  %v1122_v20 = vpop.f32.mrf.mxu1 }
 0x41e   :  { %v1568_v15 = vpop.eup %1567  ;;  %v885_v39 = vrot.slane %v878_v18, %v2083_v43  ;;  %v1168_v25 = vmul.f32 %v1166_v22, %v2058_v57  ;;  %v1176_v32 = vmul.f32 %v1166_v22, %v2061_v42  ;;  %v2256_v0 = vmul.f32 0.5, %v2233_v35 }
 0x41f   :  { %v1570_v54 = vpop.eup %1569  ;;  %v1170_v8 = vmul.f32 0.6931472, %v1568_v15  ;;  %v836_v17 = vadd.f32 %v835_v23, %v834_v6  ;;  %vm1129_vm2 = vcmp.ne.f32.partialorder %v2246_v24, 0.0  ;;  %v1154_v50 = vsub.f32 %v1152_v11, %v1981_v27  ;;  %v1504_v15 = vld [vmem:[%s2565_s4 + $0x30] sm:$0x3] }
 0x420   :  { %v1178_v7 = vmul.f32 0.6931472, %v1570_v54  ;;  %v886_v33 = vcombine.high %v885_v39, %v885_v39  ;;  %1571 = vlog2.f32 %v1168_v25  ;;  %vm1131_vm5 = vcmp.gt.f32.partialorder %v2246_v24, 0.0 }
 0x421   :  { %v841_v18 = vsel %vm547_vm11, 0.0, %v839_v1  ;;  %v2263_v10 = vmul.f32 5.0, %v1170_v8  ;;  %v837_v57 = vrot.slane %v836_v17, 1  ;;  %v1158_v42 = vsub.f32 %v1152_v11, %v1964_v21 }
 0x422   :  { %888 = vst.msk [vmem:[%s2570_s9] ss:$2 sm:$0x3] %vm2217_vm3, %v886_v33  ;;  %1573 = vlog2.f32 %v1176_v32  ;;  %v1252_v27 = vrot.slane %v2249_v28, 4  ;;  %v2593_v22 = vmov 0   ;;  %v1238_v1 = vmul.f32 %v1234_v34, %v2069_v46 }
 0x423   :  { %v1202_v59 = vsel %vm1129_vm2, 1, %v2593_v22  ;;  %v2276_v9 = vmul.f32 5.0, %v1178_v7  ;;  %v838_v62 = vadd.f32 %v837_v57, %v836_v17  ;;  %v2281_v21 = vsel %vm1131_vm5, 1, %v2593_v22 }
 0x424   :  { %v2284_v6 = vrot.slane %v1202_v59, %v1959_v12  ;;  %v2287_v60 = vmul.f32 %v1154_v50, %v1984_v40  ;;  %v1250_v23 = vrot.slane %v1238_v1, 4  ;;  %v2294_v46 = vsel %vm1126_vm4, 0.0, %v1122_v20 }
 0x425   :  { %v1235_v11 = vsub.f32 %v1122_v20, %v2076_v4  ;;  %v840_v28 = vsub.f32 %v2117_v47, %v838_v62  ;;  %vm1130_vm10 = vcmp.ne.f32.partialorder %v2294_v46, 0.0  ;;  %vm1132_vm11 = vcmp.gt.f32.partialorder %v2294_v46, 0.0  ;;  %v1505_v20 = vld [vmem:[%s2565_s4 + $0x38] sm:$0x3] }
 0x426   :  { %vm1352_vm9 = vcmp.eq.s32.totalorder %v1722_v19, %v2284_v6  ;;  %v2303_v40 = vmul.f32 %v1158_v42, %v1986_v41  ;;  %v2594_v34 = vrot.slane %v2173_v30, 4  ;;  %v1290_v47 = vrot.slane %v2281_v21, %v1959_v12 }
 0x427   :  { %v1354_v54 = vsel %vm1352_vm9, %v1807_v31, 0.0  ;;  %v842_v8 = vsel %vm548_vm14, 0.0, %v840_v28  ;;  %v2316_v39 = vsub.f32 %v1504_v15, %v1250_v23  ;;  %v2595_v25 = vmov 0.0  }
 0x428   :  { %v1251_v4 = vsel %vm2577_vm6, %v2594_v34, %v1250_v23  ;;  %v1356_v41 = vsel %vm175_vm8, %v1354_v54, 0.0  ;;  %v1511_v32 = vsel %vm1129_vm2, 1.0, %v2595_v25  ;;  %v845_v7 = vcombine.high %v841_v18, %v842_v8 }
 0x429   :  { %v1357_v30 = vrot.slane %v1356_v41, 4  ;;  %v1134_v17 = vsel %vm1132_vm11, 1, %v2593_v22  ;;  %v1203_v31 = vsel %vm1130_vm10, 1, %v2593_v22  ;;  %v2328_v36 = vsub.f32 %v1502_v37, %v1251_v4  ;;  %v1503_v37 = vld [vmem:[%s2565_s4 + $0x28] sm:$0xff] }
 0x42a   :  { %v2331_v33 = vrot.slane %v1203_v31, %v1959_v12  ;;  %v1239_v50 = vmul.f32 %v1235_v11, %v2080_v16  ;;  %v1512_v18 = vsel %vm1130_vm10, 1.0, %v2595_v25  ;;  %v852_v57 = vrot.slane %v845_v7, %v2083_v43 }
 0x42b   :  { %v1358_v42 = vadd.f32 %v1357_v30, %v1356_v41  ;;  %v1399_v59 = vcombine.high %v1511_v32, %v1512_v18  ;;  %v734_v22 = vand.u32 2147483647, %v2166_v45  ;;  %v1273_v1 = vmul.f32 0.5, %v2316_v39 }
 0x42c   :  { %v1253_v62 = vrot.slane %v1239_v50, 4  ;;  %vm1353_vm13 = vcmp.eq.s32.totalorder %v1722_v19, %v2331_v33  ;;  %v735_v16 = vand.u32 2147483647, %v2233_v35  ;;  %v2596_v15 = vrot.slane %v2195_v38, %v1959_v12 }
 0x42d   :  { %v859_v11 = vrot.slane %v852_v57, %v2083_v43  ;;  %v1359_v28 = vrot.slane %v1358_v42, 2  ;;  %v1355_v34 = vsel %vm1353_vm13, %v1815_v29, 0.0  ;;  %v1406_v19 = vrot.slane %v1399_v59, %v2083_v43  ;;  %v1572_v4 = vpop.eup %1571 }
 0x42e   :  { %vm2349_vm14 = vcmp.eq.s32.totalorder %v2596_v15, 1  ;;  %v1254_v54 = vsel %vm2577_vm6, %v1252_v27, %v1253_v62  ;;  %v1262_v8 = vsub.f32 %v1505_v20, %v1253_v62  ;;  %v1294_v38 = vrot.slane %v1134_v17, %v1959_v12 }
 0x42f   :  { %v1363_v41 = vsel %vm175_vm8, %v1355_v34, 0.0  ;;  %v860_v32 = vcombine.high %v859_v11, %v859_v11  ;;  %v1172_v7 = vmul.f32 0.6931472, %v1572_v4  ;;  %v1360_v30 = vadd.f32 %v1359_v28, %v1358_v42  ;;  %v1574_v50 = vpop.eup %1573 }
 0x430   :  { %vm2362_vm15 = vcmp.lt.f32.partialorder %v734_v22, 1.0  ;;  %v2366_v18 = vsub.f32 %v1503_v37, %v1254_v54  ;;  %v1274_v29 = vmul.f32 0.5, %v1262_v8  ;;  %v1364_v57 = vrot.slane %v1363_v41, 4 }
 0x431   :  { %v1413_v59 = vrot.slane %v1406_v19, %v2083_v43  ;;  %866 = vst.msk [vmem:[%s2569_s8] ss:$2 sm:$0x3] %vm2217_vm3, %v860_v32  ;;  %v2374_v27 = vmul.f32 5.0, %v1172_v7  ;;  %v1361_v17 = vrot.slane %v1360_v30, 1  ;;  %vm2376_vm0 = vcmp.lt.f32.partialorder %v735_v16, 1.0 }
 0x432   :  { %v746_v20 = vmul.f32 %v2190_v61, %v2166_v45  ;;  %vm2382_vm1 = vcmp.eq.s32.totalorder %v1294_v38, 1  ;;  %v1365_v15 = vadd.f32 %v1364_v57, %v1363_v41  ;;  %v747_v28 = vmul.f32 %v2256_v0, %v2233_v35 }
 0x433   :  { %v1414_v11 = vcombine.high %v1413_v59, %v1413_v59  ;;  %v1485_v37 = vadd.f32 -0.5, %v734_v22  ;;  %v2388_v34 = vmul.f32 0.6931472, %v1574_v50  ;;  %v1362_v19 = vadd.f32 %v1361_v17, %v1360_v30 }
 0x434   :  { %v1486_v4 = vadd.f32 -0.5, %v735_v16  ;;  %v2605_v54 = vrot.slane %v2133_v56, %v1959_v12  ;;  %v1366_v45 = vrot.slane %v1365_v15, 2  ;;  %v1265_v35 = vand.u32 2147483647, %v2316_v39 }
 0x435   :  { %1513 = vst.msk [vmem:[%s2570_s9 + $0x1] ss:$2 sm:$0x3] %vm2217_vm3, %v1414_v11  ;;  %v754_v61 = vsel %vm2362_vm15, %v746_v20, %v1485_v37  ;;  %v1266_v0 = vand.u32 2147483647, %v1262_v8  ;;  %v1370_v22 = vsub.f32 %v2125_v26, %v1362_v19  ;;  %v1277_v38 = vmul.f32 %v1273_v1, %v2316_v39 }
 0x436   :  { %vm2393_vm4 = vcmp.eq.s32.totalorder %v2605_v54, 1  ;;  %v755_v56 = vsel %vm2376_vm0, %v747_v28, %v1486_v4  ;;  %v1367_v41 = vadd.f32 %v1366_v45, %v1365_v15  ;;  %vm2414_vm9 = vcmp.lt.f32.partialorder %v1265_v35, 1.0 }
 0x437   :  { %v768_v16 = vsel %vm2393_vm4, %v754_v61, 0.0  ;;  %v769_v7 = vsel %vm2349_vm14, %v755_v56, 0.0  ;;  %v1372_v26 = vsel %vm1129_vm2, 0.0, %v1370_v22  ;;  %vm2421_vm13 = vcmp.lt.f32.partialorder %v1266_v0, 1.0 }
 0x438   :  { %v773_v30 = vsel %vm175_vm8, %v768_v16, 0.0  ;;  %v774_v50 = vsel %vm175_vm8, %v769_v7, 0.0  ;;  %v1278_v39 = vmul.f32 %v1274_v29, %v1262_v8  ;;  %v1368_v1 = vrot.slane %v1367_v41, 1 }
 0x439   :  { %v775_v59 = vadd.f32 %v774_v50, %v773_v30  ;;  %v1508_v17 = vadd.f32 -0.5, %v1265_v35  ;;  %v1509_v42 = vadd.f32 -0.5, %v1266_v0  ;;  %vm628_vm15 = vcmask 1042432  }
 0x43a   :  { %vm2428_vm0 = vcmp.eq.s32.totalorder %v1290_v47, 1  ;;  %v732_v15 = vand.u32 2147483647, %v2179_v5  ;;  %v733_v11 = vand.u32 2147483647, %v2239_v3  ;;  %v740_v28 = vmul.f32 0.5, %v2179_v5 }
 0x43b   :  { %v1369_v37 = vadd.f32 %v1368_v1, %v1367_v41  ;;  %776 = vadd.xlane.f32.xlu1 %v775_v59  ;;  %v1285_v8 = vsel %vm2414_vm9, %v1277_v38, %v1508_v17  ;;  %v1286_v29 = vsel %vm2421_vm13, %v1278_v39, %v1509_v42  ;;  %v741_v12 = vmul.f32 0.5, %v2239_v3 }
 0x43c   :  { %v1299_v21 = vsel %vm2428_vm0, %v1285_v8, 0.0  ;;  %v1300_v47 = vsel %vm2382_vm1, %v1286_v29, 0.0  ;;  %vm2444_vm2 = vcmp.lt.f32.partialorder %v732_v15, 1.0  ;;  %vm2448_vm6 = vcmp.lt.f32.partialorder %v733_v11, 1.0  ;;  %v631_v8 = vld [vmem:[%s2564_s3] sm:$0xff] }
 0x43d   :  { %v1371_v54 = vsub.f32 %v2128_v53, %v1369_v37  ;;  %v1304_v45 = vsel %vm175_vm8, %v1299_v21, 0.0  ;;  %v1305_v61 = vsel %vm175_vm8, %v1300_v47, 0.0  ;;  %v744_v35 = vmul.f32 %v740_v28, %v2179_v5 }
 0x43e   :  { %v1306_v0 = vadd.f32 %v1305_v61, %v1304_v45  ;;  %v745_v22 = vmul.f32 %v741_v12, %v2239_v3  ;;  %v1483_v56 = vadd.f32 -0.5, %v732_v15  ;;  %v1484_v16 = vadd.f32 -0.5, %v733_v11 }
 0x43f   :  { %v1373_v38 = vsel %vm1130_vm10, 0.0, %v1371_v54  ;;  %v1263_v41 = vand.u32 2147483647, %v2328_v36  ;;  %v1264_v7 = vand.u32 2147483647, %v2366_v18  ;;  %v1271_v53 = vmul.f32 0.5, %v2328_v36 }
 0x440   :  { %vm555_vm9 = vcmask 1046534   ;;  %v1376_v30 = vcombine.high %v1372_v26, %v1373_v38  ;;  %1307 = vadd.xlane.f32.xlu0 %v1306_v0  ;;  %v752_v5 = vsel %vm2444_vm2, %v744_v35, %v1483_v56  ;;  %v753_v3 = vsel %vm2448_vm6, %v745_v22, %v1484_v16  ;;  %v2622_v38 = vld [vmem:[#allocation9_spill] sm:$0xff] }
 0x441   :  { %v1272_v31 = vmul.f32 0.5, %v2366_v18  ;;  %v766_v50 = vsel %vm2393_vm4, %v752_v5, 0.0  ;;  %v767_v57 = vsel %vm2349_vm14, %v753_v3, 0.0  ;;  %vm2471_vm10 = vcmp.lt.f32.partialorder %v1263_v41, 1.0 }
 0x442   :  { %vm2475_vm13 = vcmp.lt.f32.partialorder %v1264_v7, 1.0  ;;  %v1383_v1 = vrot.slane %v1376_v30, %v2083_v43  ;;  %v770_v59 = vadd.f32 %v767_v57, %v766_v50  ;;  %v1275_v17 = vmul.f32 %v1271_v53, %v2328_v36 }
 0x443   :  { %v1276_v42 = vmul.f32 %v1272_v31, %v2366_v18  ;;  %v1506_v32 = vadd.f32 -0.5, %v1263_v41  ;;  %v1507_v15 = vadd.f32 -0.5, %v1264_v7  ;;  %v626_v23 = vsel %vm175_vm8, %v2136_v49, %v2203_v44 }
 0x444   :  { %v627_v11 = vsel %vm175_vm8, %v2146_v58, %v2228_v63  ;;  %v1182_v28 = vmul.f32 5.0, %v2388_v34  ;;  %v1390_v37 = vrot.slane %v1383_v1, %v2083_v43  ;;  %771 = vadd.xlane.f32.xlu1 %v770_v59  ;;  %v629_v36 = vsel %vm628_vm15, %v626_v23, %v2221_v52 }
 0x445   :  { %v630_v18 = vsel %vm628_vm15, %v627_v11, %v2237_v14  ;;  %v1184_v49 = vsel %vm623_vm7, %v2287_v60, %v2303_v40  ;;  %v1283_v58 = vsel %vm2471_vm10, %v1275_v17, %v1506_v32  ;;  %v1284_v43 = vsel %vm2475_vm13, %v1276_v42, %v1507_v15 }
 0x446   :  { %v634_v44 = vcombine.low %v629_v36, %v630_v18  ;;  %v1391_v63 = vcombine.high %v1390_v37, %v1390_v37  ;;  %v1297_v52 = vsel %vm2428_vm0, %v1283_v58, 0.0  ;;  %v1298_v14 = vsel %vm2382_vm1, %v1284_v43, 0.0 }
 0x447   :  { %v1185_v34 = vsel %vm175_vm8, %v2208_v13, %v2263_v10  ;;  %v1499_v60 = vsel %vm1132_vm11, 1.0, %v2595_v25  ;;  %v1301_v40 = vadd.f32 %v1298_v14, %v1297_v52  ;;  %v1186_v12 = vsel %vm175_vm8, %v1184_v49, %v2374_v27  ;;  %v1500_v10 = vld [vmem:[%s2564_s3 + $0x8] sm:$0xff]  ;;  %s1649_s3 = smov [#allocation4]  }
 0x448   :  { %v636_v29 = vsub.f32 %v631_v8, %v634_v44  ;;  %1510 = vst.msk [vmem:[%s2569_s8 + $0x1] ss:$2 sm:$0x3] %vm2217_vm3, %v1391_v63  ;;  %v1187_v62 = vsel %vm628_vm15, %v1185_v34, %v2276_v9  ;;  %v1188_v13 = vsel %vm628_vm15, %v1186_v12, %v1182_v28  ;;  %v1480_v46 = vsel %vm549_vm12, 1.0, %v2595_v25  ;;  %s1439_s8 = sshll.u32 %s1649_s3, 4  ;;  %s1440_s8 = int_to_ptr.vmem [resolvable:$true] %s1439_s8 }
 0x449   :  { %1302 = vadd.xlane.f32.xlu0 %v1301_v40  ;;  %v1193_v20 = vcombine.low %v1187_v62, %v1188_v13  ;;  %v556_v21 = vsel %vm555_vm9, %v1480_v46, 0.0  ;;  %v557_v47 = vsel %vm555_vm9, %v2201_v51, 0.0  ;;  %v1498_v9 = vsel %vm1131_vm5, 1.0, %v2595_v25  ;;  %s1575_s13 = scalar_lea.vmem %s1440_s8, 16  ;;  %s1579_s14 = scalar_lea.vmem %s1440_s8, 32 }
 0x44a   :  { %v637_v27 = vand.u32 2147483647, %v636_v29  ;;  %v639_v55 = vmul.f32 0.5, %v636_v29  ;;  %v1138_v19 = vsel %vm555_vm9, %v1499_v60, 0.0  ;;  %vm653_vm7 = vcmp.eq.s32.totalorder %v2120_v48, 1  ;;  %p1576_p0 = scmp.ne.s32.totalorder %s1440_s8, %s1575_s13  ;;  %p1580_p1 = scmp.lt.s32.totalorder %s1440_s8, %s1440_s8 }
 0x44b   :  { %v1195_v2 = vsub.f32 %v1500_v10, %v1193_v20  ;;  %v558_v45 = vadd.f32 %v557_v47, %v556_v21  ;;  %v1137_v61 = vsel %vm555_vm9, %v1498_v9, 0.0  ;;  %vm654_vm12 = vcmp.eq.s32.totalorder %v2622_v38, 1  ;;  %p1581_p2 = scmp.lt.s32.totalorder %s1579_s14, %s1575_s13 }
 0x44c   :  { %vm638_vm6 = vcmp.lt.f32.partialorder %v637_v27, 1.0  ;;  %v640_v4 = vmul.f32 %v639_v55, %v636_v29  ;;  %v1482_v54 = vadd.f32 -0.5, %v637_v27  ;;  %v1139_v56 = vadd.f32 %v1138_v19, %v1137_v61 }
 0x44d   :  { %v1196_v0 = vand.u32 2147483647, %v1195_v2  ;;  %v1198_v22 = vmul.f32 0.5, %v1195_v2  ;;  %vm2623_vm5 = vcmask 1043456   ;;  %vm1212_vm14 = vcmp.eq.s32.totalorder %v2284_v6, 1  ;;  %p1582_p3 = por %p1581_p2, %p1580_p1 }
 0x44e   :  { %v642_v35 = vsel %vm638_vm6, %v640_v4, %v1482_v54  ;;  %vm2624_vm11 = vmmov %vm2623_vm5  ;;  %vm1213_vm1 = vcmp.eq.s32.totalorder %v2331_v33, 1 }
 0x44f   :  { %v656_v51 = vcombine.high %v642_v35, %v642_v35  ;;  %v658_v16 = vsel %vm653_vm7, %v642_v35, 0.0  ;;  %vm1197_vm3 = vcmp.lt.f32.partialorder %v1196_v0, 1.0  ;;  %v1199_v24 = vmul.f32 %v1198_v22, %v1195_v2  ;;  %vm2625_vm4 = vmmov %vm2623_vm5  ;;  %p1583_p4 = pnand %p1582_p3, %p1576_p0 }
 0x450   :  { %v1501_v25 = vadd.f32 -0.5, %v1196_v0  ;;  %v661_v7 = vsel %vm2623_vm5, %v658_v16, 0.0  ;;  %vm2626_vm15 = vmmov %vm2625_vm4 }
 0x451   :  { %v659_v41 = vsel %vm654_vm12, %v656_v51, 0.0  ;;  %vm2627_vm0 = vmmov %vm2625_vm4 }
 0x452   :  { %v662_v53 = vsel %vm2624_vm11, %v659_v41, 0.0  ;;  %v1201_v48 = vsel %vm1197_vm3, %v1199_v24, %v1501_v25  ;;  %vm2628_vm2 = vmmov %vm2627_vm0 }
 0x453   :  { %v663_v30 = vadd.f32 %v662_v53, %v661_v7  ;;  %v1215_v5 = vcombine.high %v1201_v48, %v1201_v48  ;;  %v1217_v3 = vsel %vm1212_vm14, %v1201_v48, 0.0 }
 0x454   :  { %v1219_v50 = vsel %vm2625_vm4, %v1217_v3, 0.0 }
 0x455   :  { %664 = vadd.xlane.f32.xlu1 %v663_v30  ;;  %v1218_v31 = vsel %vm1213_vm1, %v1215_v5, 0.0 }
 0x456   :  { %v1220_v57 = vsel %vm2626_vm15, %v1218_v31, 0.0 }
 0x457   :  { %v1221_v39 = vadd.f32 %v1220_v57, %v1219_v50 }
 0x459   :  { %1222 = vadd.xlane.f32.xlu0 %v1221_v39  ;;  %559 = vadd.xlane.f32.xlu1 %v558_v45 }
 0x45d   :  { %1140 = vadd.xlane.f32.xlu0 %v1139_v56 }
 0x4c4   :  { %v777_v26 = vpop.xlane.xlu1 %776 }
 0x4c5   :  { %v778_v59 = vsel %vm175_vm8, %v777_v26, 0.0 }
 0x4c9   :  { %v1308_v1 = vpop.xlane.xlu0 %1307 }
 0x4ca   :  { %v1309_v32 = vsel %vm175_vm8, %v1308_v1, 0.0  ;;  %vm1418_vm8 = vcmask 0  }
 0x4cd   :  { %v772_v6 = vpop.xlane.xlu1 %771 }
 0x4ce   :  { %v779_v17 = vadd.f32 %v778_v59, %v772_v6 }
 0x4d0   :  { %v780_v42 = vrot.slane %v779_v17, 4 }
 0x4d2   :  { %v781_v33 = vadd.f32 %v780_v42, %v779_v17  ;;  %v1303_v15 = vpop.xlane.xlu0 %1302 }
 0x4d3   :  { %v1310_v23 = vadd.f32 %v1309_v32, %v1303_v15 }
 0x4d4   :  { %v782_v11 = vrot.slane %v781_v33, 2 }
 0x4d5   :  { %v1311_v28 = vrot.slane %v1310_v23, 4 }
 0x4d6   :  { %v783_v37 = vadd.f32 %v782_v11, %v781_v33 }
 0x4d7   :  { %v1312_v36 = vadd.f32 %v1311_v28, %v1310_v23 }
 0x4d8   :  { %v784_v8 = vrot.slane %v783_v37, 1 }
 0x4d9   :  { %v1313_v18 = vrot.slane %v1312_v36, 2 }
 0x4da   :  { %v785_v52 = vadd.f32 %v784_v8, %v783_v37 }
 0x4db   :  { %v1314_v49 = vadd.f32 %v1313_v18, %v1312_v36 }
 0x4dd   :  { %v1315_v58 = vrot.slane %v1314_v49, 1 }
 0x4de   :  { %v665_v43 = vpop.xlane.xlu1 %664 }
 0x4df   :  { %v666_v44 = vsel %vm2627_vm0, %v665_v43, 0.0  ;;  %v1316_v14 = vadd.f32 %v1315_v58, %v1314_v49 }
 0x4e0   :  { %v667_v63 = vrot.slane %v666_v44, 4 }
 0x4e1   :  { %v1317_v40 = vadd.f32 %v1316_v14, %v785_v52 }
 0x4e2   :  { %v668_v34 = vadd.f32 %v667_v63, %v666_v44  ;;  %v1223_v60 = vpop.xlane.xlu0 %1222 }
 0x4e3   :  { %v1224_v29 = vsel %vm2628_vm2, %v1223_v60, 0.0  ;;  %1420 = vst.msk [vmem:[#allocation4] sm:$0x1] %vm1418_vm8, %v1317_v40 }
 0x4e4   :  { %v669_v12 = vrot.slane %v668_v34, 2  ;;  %v1225_v62 = vrot.slane %v1224_v29, 4 }
 0x4e5   :  { %1586 = shalt.err (!%p1583_p4)
}
 0x4e6   :  { %1442 = dma.vmem_to_hbm [thread:$0]  %s1440_s8, 16, %s2568_s7, [#allocation5]   ;;  %v670_v13 = vadd.f32 %v669_v12, %v668_v34  ;;  %v1226_v10 = vadd.f32 %v1225_v62, %v1224_v29  ;;  %v560_v46 = vpop.xlane.xlu1 %559  ;;  %v1141_v27 = vpop.xlane.xlu0 %1140  ;;  %vm1421_vm9 = vcmask 6150  }
 0x4e7   :  { %v1142_v55 = vadd.f32 %v1141_v27, %v560_v46  ;;  %s1595_s17 = scalar_lea.vmem %s1454_s12, 16  ;;  %s1599_s18 = scalar_lea.vmem %s1454_s12, 32 }
 0x4e8   :  { %v1227_v20 = vrot.slane %v1226_v10, 2  ;;  %v671_v21 = vrot.slane %v670_v13, 1  ;;  %p1596_p5 = scmp.ne.s32.totalorder %s1454_s12, %s1595_s17  ;;  %p1600_p6 = scmp.lt.s32.totalorder %s1454_s12, %s1454_s12 }
 0x4e9   :  { %1422 = vst.msk [vmem:[#allocation6 - $0x6] sm:$0x40] %vm1421_vm9, %v1142_v55  ;;  %p1601_p7 = scmp.lt.s32.totalorder %s1599_s18, %s1595_s17 }
 0x4ea   :  { %v1228_v47 = vadd.f32 %v1227_v20, %v1226_v10 }
 0x4eb   :  { %p1602_p8 = por %p1601_p7, %p1600_p6 }
 0x4ed   :  { %p1603_p9 = pnand %p1602_p8, %p1596_p5 }
 0x4ef   :  { %1606 = shalt.err (!%p1603_p9)
}
 0x4f0   :  { %1456 = dma.vmem_to_hbm [thread:$0]  %s1454_s12, 16, %s2571_s10, [#allocation5]   ;;  %v1229_v9 = vrot.slane %v1228_v47, 1  ;;  %v672_v19 = vadd.f32 %v671_v21, %v670_v13 }
 0x4f1   :  { %s1651_s19 = smov [#allocation2]  }
 0x4f2   :  { %s1429_s2 = sshll.u32 %s1651_s19, 4  ;;  %v1230_v4 = vadd.f32 %v1229_v9, %v1228_v47  ;;  %s1430_s2 = int_to_ptr.vmem [resolvable:$true] %s1429_s2 }
 0x4f3   :  { %s1615_s20 = scalar_lea.vmem %s1430_s2, 16  ;;  %s1619_s21 = scalar_lea.vmem %s1430_s2, 32 }
 0x4f4   :  { %v1231_v54 = vadd.f32 %v1230_v4, %v672_v19  ;;  %p1616_p10 = scmp.ne.s32.totalorder %s1430_s2, %s1615_s20  ;;  %p1620_p11 = scmp.lt.s32.totalorder %s1430_s2, %s1430_s2 }
 0x4f5   :  { %p1621_p12 = scmp.lt.s32.totalorder %s1619_s21, %s1615_s20 }
 0x4f6   :  { %1419 = vst.msk [vmem:[#allocation2] sm:$0x1] %vm1418_vm8, %v1231_v54 }
 0x4f7   :  { %p1622_p13 = por %p1621_p12, %p1620_p11 }
 0x4f9   :  { %p1623_p0 = pnand %p1622_p13, %p1616_p10 }
 0x4fb   :  { %1626 = shalt.err (!%p1623_p0)
}
 0x4fc   :  { %1432 = dma.vmem_to_hbm [thread:$0]  %s1430_s2, 16, %s2567_s6, [#allocation3]  }
 0x4fd   :  { %1635 = dma.done.wait [#allocation3], 16  }
 0x4fe   :  { %1636 = vsyncadd [#allocation3], 4294967280 }
 0x4ff   :  { %1637 = dma.done.wait [#allocation5], 32  }
 0x500   :  { %1638 = vsyncadd [#allocation5], 4294967264 }
 0x501   :  { %1470 = vsyncpa [#allocation3], 1 }
 0x502   :  { %1471 = vsyncpa [#allocation5], 1 }

</bundles_post_ra>
